<compile_context>
chip_gen: v7x
topology: tpu7x:2x2x1
jax: 0.10.0
libtpu: 0.0.40
codegen_flags: <defaults>
</compile_context>

<pallas_src>
from functools import partial

import jax
import jax.numpy as jnp
from jax.experimental import pallas as pl
from jax.experimental.pallas import tpu as pltpu


def _round_up(x, m):
    return ((x + m - 1) // m) * m


def _pad2(a, rows, cols, dtype):
    a = jnp.asarray(a)
    return jnp.pad(a, ((0, rows - a.shape[0]), (0, cols - a.shape[1]))).astype(dtype)


# ---------------------------------------------------------------------------
# Fused kernel: packed stage-1 GEMM + clinical-params MLP + classifier
# ---------------------------------------------------------------------------
def _backbone_kernel(
    x_ref,                 # (TB, Kf)  packed bf16: [x_params | m1 | m2 | 0]
    wf_ref, bfu_ref,       # fused stage 1: (Kf, Nf) bf16, (1, Nf) f32
    w2_ref, b2_ref,        # params MLP:    (512, 256) bf16, (1, 256) f32
    w3_ref, b3_ref,        #                (256, 128) bf16, (1, 128) f32
    cw1a_ref, cw1m_ref,    # classifier L1: (128, 128) bf16, (L1p+L2p, 128) bf16
    cb1_ref,               #                (1, 128) f32
    cw2_ref, cb2_ref,      # (128, 128 padded) bf16, (1, 128) f32
    cw3_ref, cb3_ref,      # (128, 128 padded) bf16, (1, 128) f32
    out_ref,               # (TB, 1) f32
):
    f32 = jnp.float32
    bf16 = jnp.bfloat16

    x = x_ref[...]  # already bf16

    # --- fused stage 1: params-MLP layer 1 pre-act + both encoder mu's ------
    # column layout of r: [0:512) = xp@w1+b1, [512:512+L1p) = mu1, rest = mu2
    r = jnp.dot(x, wf_ref[...], preferred_element_type=f32) + bfu_ref[...]
    h = jnp.maximum(r[:, :512], 0.0).astype(bf16)
    mu = r[:, 512:].astype(bf16)                 # (TB, L1p + L2p)

    # --- rest of x_params_backbone: Linear-ReLU-Linear -----------------------
    h = jnp.dot(h, w2_ref[...], preferred_element_type=f32) + b2_ref[...]
    h = jnp.maximum(h, 0.0).astype(bf16)
    xpb = (jnp.dot(h, w3_ref[...], preferred_element_type=f32) + b3_ref[...]).astype(bf16)

    # --- classifier layer 1: concat replaced by split-weight accumulation ----
    h = (jnp.dot(xpb, cw1a_ref[...], preferred_element_type=f32)
         + jnp.dot(mu, cw1m_ref[...], preferred_element_type=f32)
         + cb1_ref[...])
    h = jnp.maximum(h, 0.0).astype(bf16)          # Dropout -> identity (eval)
    h = jnp.dot(h, cw2_ref[...], preferred_element_type=f32) + cb2_ref[...]
    h = jnp.maximum(h, 0.0).astype(bf16)          # Dropout -> identity (eval)
    logits = jnp.dot(h, cw3_ref[...], preferred_element_type=f32) + cb3_ref[...]

    # Only lane 0 is real (cw3/cb3 are zero-padded) -> compressed writeback.
    out_ref[...] = logits[:, 0:1]


# ---------------------------------------------------------------------------
# Parameter preparation: block-structured fused weights, lane-dense padding
# ---------------------------------------------------------------------------
def prepare_params(p, clinical_params_size, modality_feat_sizes, latent_dim_sizes):
    bf16, f32 = jnp.bfloat16, jnp.float32
    F1, F2 = modality_feat_sizes
    L1, L2 = latent_dim_sizes
    Pc = clinical_params_size
    L1p, L2p = _round_up(L1, 128), _round_up(L2, 128)
    Kf = _round_up(Pc + F1 + F2, 128)
    Nf = 512 + L1p + L2p

    # Fused stage-1 weight/bias: rows follow the packed input layout
    # [0:Pc)=x_params, [Pc:Pc+F1)=m1, [Pc+F1:Pc+F1+F2)=m2; zero elsewhere.
    wf = jnp.zeros((Kf, Nf), f32)
    wf = wf.at[0:Pc, 0:512].set(jnp.asarray(p["w1"], f32))
    wf = wf.at[Pc:Pc + F1, 512:512 + L1].set(jnp.asarray(p["enc1_w"], f32))
    wf = wf.at[Pc + F1:Pc + F1 + F2, 512 + L1p:512 + L1p + L2].set(
        jnp.asarray(p["enc2_w"], f32))
    bfu = jnp.zeros((1, Nf), f32)
    bfu = bfu.at[:, 0:512].set(jnp.asarray(p["b1"], f32))
    bfu = bfu.at[:, 512:512 + L1].set(jnp.asarray(p["enc1_b"], f32))
    bfu = bfu.at[:, 512 + L1p:512 + L1p + L2].set(jnp.asarray(p["enc2_b"], f32))

    # Classifier layer-1 weight split: rows 0:128 -> xpb, merged mu part with
    # the same zero-padded column layout as the fused stage-1 output.
    cw1 = jnp.asarray(p["cw1"], f32)                       # (128 + L1 + L2, 128)
    cw1m = jnp.zeros((L1p + L2p, 128), f32)
    cw1m = cw1m.at[0:L1].set(cw1[128:128 + L1])
    cw1m = cw1m.at[L1p:L1p + L2].set(cw1[128 + L1:128 + L1 + L2])

    q = {
        "wf": wf.astype(bf16),
        "bfu": bfu.astype(f32),
        "w2": jnp.asarray(p["w2"]).astype(bf16),
        "b2": jnp.asarray(p["b2"]).astype(f32),
        "w3": jnp.asarray(p["w3"]).astype(bf16),
        "b3": jnp.asarray(p["b3"]).astype(f32),
        "cw1a": cw1[:128].astype(bf16),
        "cw1m": cw1m.astype(bf16),
        "cb1": jnp.asarray(p["cb1"]).astype(f32),
        "cw2": _pad2(p["cw2"], 128, 128, bf16),            # (128, 64) -> (128, 128)
        "cb2": _pad2(p["cb2"], 1, 128, f32),
        "cw3": _pad2(p["cw3"], 128, 128, bf16),            # (64, 1)  -> (128, 128)
        "cb3": _pad2(p["cb3"], 1, 128, f32),
    }
    return q


# ---------------------------------------------------------------------------
# Wrapper: batch grid, VMEM-resident weights, packed bf16 input slab
# ---------------------------------------------------------------------------
def _default_block_b(B):
    bp = _round_up(max(B, 1), 16)        # bf16 sublane tile is (16, 128)
    if bp <= 256:
        return bp                        # single small tile
    if bp <= 1024:
        return 256                       # >=2 grid steps (megacore on v7x)
    return 512


@partial(jax.jit, static_argnames=("block_b",))
def _forward(x_modalities, x_params, q, block_b):
    m1, m2 = x_modalities
    B = x_params.shape[0]
    b_pad = _round_up(B, block_b)
    kf = q["wf"].shape[0]
    bf16 = jnp.bfloat16

    # Pack [x_params | m1 | m2] into one bf16 slab; fuses with pad/cast in jit.
    feats = jnp.concatenate(
        [x_params.astype(bf16), m1.astype(bf16), m2.astype(bf16)], axis=1)
    packed = jnp.pad(feats, ((0, b_pad - B), (0, kf - feats.shape[1])))

    weights = (q["wf"], q["bfu"], q["w2"], q["b2"], q["w3"], q["b3"],
               q["cw1a"], q["cw1m"], q["cb1"],
               q["cw2"], q["cb2"], q["cw3"], q["cb3"])

    def weight_spec(shape):
        # Constant block index -> stays resident in VMEM across grid steps.
        return pl.BlockSpec(shape, lambda i: (0, 0))

    in_specs = [pl.BlockSpec((block_b, kf), lambda i: (i, 0))]
    in_specs += [weight_spec(w.shape) for w in weights]

    out = pl.pallas_call(
        _backbone_kernel,
        out_shape=jax.ShapeDtypeStruct((b_pad, 1), jnp.float32),
        grid=(b_pad // block_b,),
        in_specs=in_specs,
        out_specs=pl.BlockSpec((block_b, 1), lambda i: (i, 0)),
        compiler_params=pltpu.CompilerParams(
            dimension_semantics=("parallel",)),
    )(packed, *weights)

    return out[:B]


def multimodal_backbone(x_modalities, x_params, padded_params, *, block_b=None):
    """x_modalities: tuple of (B, F_i); x_params: (B, Pc). Returns (B, 1) f32."""
    B = x_params.shape[0]
    if block_b is None:
        block_b = _default_block_b(B)
    block_b = max(16, _round_up(int(block_b), 16))
    return _forward(tuple(x_modalities), x_params, padded_params, block_b)


# ---------------------------------------------------------------------------
# Deterministic parameter construction (synthetic — no checkpoint load)
# ---------------------------------------------------------------------------
def make_params(key, clinical_params_size, modality_feat_sizes, latent_dim_sizes):
    keys = jax.random.split(key, 8)
    ki = iter(keys)

    def lin(k, fan_in, fan_out):
        scale = 1.0 / jnp.sqrt(jnp.float32(fan_in))
        kw, kb = jax.random.split(k)
        w = jax.random.uniform(kw, (fan_in, fan_out), jnp.float32, -scale, scale)
        b = jax.random.uniform(kb, (1, fan_out), jnp.float32, -scale, scale)
        return w, b

    F1, F2 = modality_feat_sizes
    L1, L2 = latent_dim_sizes
    Pc = clinical_params_size
    concat_len = 128 + L1 + L2

    p = {}
    p["enc1_w"], p["enc1_b"] = lin(next(ki), F1, L1)
    p["enc2_w"], p["enc2_b"] = lin(next(ki), F2, L2)
    p["w1"], p["b1"] = lin(next(ki), Pc, 512)
    p["w2"], p["b2"] = lin(next(ki), 512, 256)
    p["w3"], p["b3"] = lin(next(ki), 256, 128)
    p["cw1"], p["cb1"] = lin(next(ki), concat_len, 128)
    p["cw2"], p["cb2"] = lin(next(ki), 128, 64)
    p["cw3"], p["cb3"] = lin(next(ki), 64, 1)
    return p


# ---------------------------------------------------------------------------
# Pure-JAX reference (same bf16-operand / f32-accumulate policy as the kernel)
# ---------------------------------------------------------------------------
def reference(x_modalities, x_params, p):
    bf16, f32 = jnp.bfloat16, jnp.float32

    def dot(a, w):
        return jnp.dot(a.astype(bf16), w.astype(bf16), preferred_element_type=f32)

    m1, m2 = x_modalities
    mu1 = dot(m1, p["enc1_w"]) + p["enc1_b"]
    mu2 = dot(m2, p["enc2_w"]) + p["enc2_b"]
    h = jnp.maximum(dot(x_params, p["w1"]) + p["b1"], 0.0)
    h = jnp.maximum(dot(h, p["w2"]) + p["b2"], 0.0)
    xpb = dot(h, p["w3"]) + p["b3"]
    x = jnp.concatenate([xpb, mu1, mu2], axis=1)
    h = jnp.maximum(dot(x, p["cw1"]) + p["cb1"], 0.0)
    h = jnp.maximum(dot(h, p["cw2"]) + p["cb2"], 0.0)
    return dot(h, p["cw3"]) + p["cb3"]


if __name__ == "__main__":
    B = 2
    clinical_params_size = 16
    modality_feat_sizes = (32, 48)
    latent_dim_sizes = (32, 64)

    key = jax.random.PRNGKey(0)
    kp, kx, km1, km2 = jax.random.split(key, 4)

    params = make_params(kp, clinical_params_size, modality_feat_sizes, latent_dim_sizes)
    padded = prepare_params(params, clinical_params_size, modality_feat_sizes,
                            latent_dim_sizes)

    x_params = jax.random.normal(kx, (B, clinical_params_size), jnp.float32)
    mod1 = jax.random.normal(km1, (B, modality_feat_sizes[0]), jnp.float32)
    mod2 = jax.random.normal(km2, (B, modality_feat_sizes[1]), jnp.float32)

    out = multimodal_backbone((mod1, mod2), x_params, padded)
    out = jax.block_until_ready(out)

    ref = reference((mod1, mod2), x_params, params)
    assert out.shape == (B, 1), out.shape
    assert jnp.allclose(out, ref, atol=1e-3, rtol=1e-3), (out, ref)

    print("KERNEL_OK")
</pallas_src>

<mosaic_0001>
module attributes {stable_mosaic.version = 11 : i64} {
  func.func @_backbone_kernel(%arg0: i32, %arg1: memref<16x128xbf16, #tpu.memory_space<vmem>>, %arg2: memref<128x768xbf16, #tpu.memory_space<vmem>>, %arg3: memref<1x768xf32, #tpu.memory_space<vmem>>, %arg4: memref<512x256xbf16, #tpu.memory_space<vmem>>, %arg5: memref<1x256xf32, #tpu.memory_space<vmem>>, %arg6: memref<256x128xbf16, #tpu.memory_space<vmem>>, %arg7: memref<1x128xf32, #tpu.memory_space<vmem>>, %arg8: memref<128x128xbf16, #tpu.memory_space<vmem>>, %arg9: memref<256x128xbf16, #tpu.memory_space<vmem>>, %arg10: memref<1x128xf32, #tpu.memory_space<vmem>>, %arg11: memref<128x128xbf16, #tpu.memory_space<vmem>>, %arg12: memref<1x128xf32, #tpu.memory_space<vmem>>, %arg13: memref<128x128xbf16, #tpu.memory_space<vmem>>, %arg14: memref<1x128xf32, #tpu.memory_space<vmem>>, %arg15: memref<16x1xf32, #tpu.memory_space<vmem>>) attributes {dimension_semantics = [#tpu.dimension_semantics<parallel>], iteration_bounds = array<i64: 1>, scalar_prefetch = 0 : i64, scratch_operands = 0 : i64, tpu.core_type = #tpu.core_type<tc>, window_params = [{transform_indices = @transform_0, window_bounds = array<i64: 16, 128>}, {pipeline_mode = #tpu.pipeline_mode<synchronous>, transform_indices = @transform_1, window_bounds = array<i64: 128, 768>}, {pipeline_mode = #tpu.pipeline_mode<synchronous>, transform_indices = @transform_2, window_bounds = array<i64: 1, 768>}, {pipeline_mode = #tpu.pipeline_mode<synchronous>, transform_indices = @transform_3, window_bounds = array<i64: 512, 256>}, {pipeline_mode = #tpu.pipeline_mode<synchronous>, transform_indices = @transform_4, window_bounds = array<i64: 1, 256>}, {pipeline_mode = #tpu.pipeline_mode<synchronous>, transform_indices = @transform_5, window_bounds = array<i64: 256, 128>}, {pipeline_mode = #tpu.pipeline_mode<synchronous>, transform_indices = @transform_6, window_bounds = array<i64: 1, 128>}, {pipeline_mode = #tpu.pipeline_mode<synchronous>, transform_indices = @transform_7, window_bounds = array<i64: 128, 128>}, {pipeline_mode = #tpu.pipeline_mode<synchronous>, transform_indices = @transform_8, window_bounds = array<i64: 256, 128>}, {pipeline_mode = #tpu.pipeline_mode<synchronous>, transform_indices = @transform_9, window_bounds = array<i64: 1, 128>}, {pipeline_mode = #tpu.pipeline_mode<synchronous>, transform_indices = @transform_10, window_bounds = array<i64: 128, 128>}, {pipeline_mode = #tpu.pipeline_mode<synchronous>, transform_indices = @transform_11, window_bounds = array<i64: 1, 128>}, {pipeline_mode = #tpu.pipeline_mode<synchronous>, transform_indices = @transform_12, window_bounds = array<i64: 128, 128>}, {pipeline_mode = #tpu.pipeline_mode<synchronous>, transform_indices = @transform_13, window_bounds = array<i64: 1, 128>}, {transform_indices = @transform_14, window_bounds = array<i64: 16, 1>}]} {
    %c0 = arith.constant 0 : index
    %c0_0 = arith.constant 0 : index
    %0 = vector.load %arg1[%c0, %c0_0] : memref<16x128xbf16, #tpu.memory_space<vmem>>, vector<16x128xbf16>
    %c0_1 = arith.constant 0 : index
    %c0_2 = arith.constant 0 : index
    %1 = vector.load %arg2[%c0_1, %c0_2] : memref<128x768xbf16, #tpu.memory_space<vmem>>, vector<128x768xbf16>
    %cst = arith.constant dense<0.000000e+00> : vector<16x768xf32>
    %2 = tpu.matmul %0, %1, %cst {dimension_numbers = #tpu.dot_dimension_numbers<[1], [0], [0], [1], [0, 0, 1, 1], [], []>} : vector<16x128xbf16>, vector<128x768xbf16>, vector<16x768xf32> -> vector<16x768xf32>
    %c0_3 = arith.constant 0 : index
    %c0_4 = arith.constant 0 : index
    %3 = vector.load %arg3[%c0_3, %c0_4] : memref<1x768xf32, #tpu.memory_space<vmem>>, vector<1x768xf32>
    %4 = vector.broadcast %3 : vector<1x768xf32> to vector<16x768xf32>
    %5 = arith.addf %2, %4 : vector<16x768xf32>
    %6 = vector.extract_strided_slice %5 {offsets = [0, 0], sizes = [16, 512], strides = [1, 1]} : vector<16x768xf32> to vector<16x512xf32>
    %cst_5 = arith.constant 0.000000e+00 : f32
    %7 = vector.broadcast %cst_5 : f32 to vector<16x512xf32>
    %8 = arith.maximumf %6, %7 : vector<16x512xf32>
    %9 = arith.truncf %8 : vector<16x512xf32> to vector<16x512xbf16>
    %10 = vector.extract_strided_slice %5 {offsets = [0, 512], sizes = [16, 256], strides = [1, 1]} : vector<16x768xf32> to vector<16x256xf32>
    %11 = arith.truncf %10 : vector<16x256xf32> to vector<16x256xbf16>
    %c0_6 = arith.constant 0 : index
    %c0_7 = arith.constant 0 : index
    %12 = vector.load %arg4[%c0_6, %c0_7] : memref<512x256xbf16, #tpu.memory_space<vmem>>, vector<512x256xbf16>
    %cst_8 = arith.constant dense<0.000000e+00> : vector<16x256xf32>
    %13 = tpu.matmul %9, %12, %cst_8 {dimension_numbers = #tpu.dot_dimension_numbers<[1], [0], [0], [1], [0, 0, 1, 1], [], []>} : vector<16x512xbf16>, vector<512x256xbf16>, vector<16x256xf32> -> vector<16x256xf32>
    %c0_9 = arith.constant 0 : index
    %c0_10 = arith.constant 0 : index
    %14 = vector.load %arg5[%c0_9, %c0_10] : memref<1x256xf32, #tpu.memory_space<vmem>>, vector<1x256xf32>
    %15 = vector.broadcast %14 : vector<1x256xf32> to vector<16x256xf32>
    %16 = arith.addf %13, %15 : vector<16x256xf32>
    %cst_11 = arith.constant 0.000000e+00 : f32
    %17 = vector.broadcast %cst_11 : f32 to vector<16x256xf32>
    %18 = arith.maximumf %16, %17 : vector<16x256xf32>
    %19 = arith.truncf %18 : vector<16x256xf32> to vector<16x256xbf16>
    %c0_12 = arith.constant 0 : index
    %c0_13 = arith.constant 0 : index
    %20 = vector.load %arg6[%c0_12, %c0_13] : memref<256x128xbf16, #tpu.memory_space<vmem>>, vector<256x128xbf16>
    %cst_14 = arith.constant dense<0.000000e+00> : vector<16x128xf32>
    %21 = tpu.matmul %19, %20, %cst_14 {dimension_numbers = #tpu.dot_dimension_numbers<[1], [0], [0], [1], [0, 0, 1, 1], [], []>} : vector<16x256xbf16>, vector<256x128xbf16>, vector<16x128xf32> -> vector<16x128xf32>
    %c0_15 = arith.constant 0 : index
    %c0_16 = arith.constant 0 : index
    %22 = vector.load %arg7[%c0_15, %c0_16] : memref<1x128xf32, #tpu.memory_space<vmem>>, vector<1x128xf32>
    %23 = vector.broadcast %22 : vector<1x128xf32> to vector<16x128xf32>
    %24 = arith.addf %21, %23 : vector<16x128xf32>
    %25 = arith.truncf %24 : vector<16x128xf32> to vector<16x128xbf16>
    %c0_17 = arith.constant 0 : index
    %c0_18 = arith.constant 0 : index
    %26 = vector.load %arg8[%c0_17, %c0_18] : memref<128x128xbf16, #tpu.memory_space<vmem>>, vector<128x128xbf16>
    %cst_19 = arith.constant dense<0.000000e+00> : vector<16x128xf32>
    %27 = tpu.matmul %25, %26, %cst_19 {dimension_numbers = #tpu.dot_dimension_numbers<[1], [0], [0], [1], [0, 0, 1, 1], [], []>} : vector<16x128xbf16>, vector<128x128xbf16>, vector<16x128xf32> -> vector<16x128xf32>
    %c0_20 = arith.constant 0 : index
    %c0_21 = arith.constant 0 : index
    %28 = vector.load %arg9[%c0_20, %c0_21] : memref<256x128xbf16, #tpu.memory_space<vmem>>, vector<256x128xbf16>
    %cst_22 = arith.constant dense<0.000000e+00> : vector<16x128xf32>
    %29 = tpu.matmul %11, %28, %cst_22 {dimension_numbers = #tpu.dot_dimension_numbers<[1], [0], [0], [1], [0, 0, 1, 1], [], []>} : vector<16x256xbf16>, vector<256x128xbf16>, vector<16x128xf32> -> vector<16x128xf32>
    %30 = arith.addf %27, %29 : vector<16x128xf32>
    %c0_23 = arith.constant 0 : index
    %c0_24 = arith.constant 0 : index
    %31 = vector.load %arg10[%c0_23, %c0_24] : memref<1x128xf32, #tpu.memory_space<vmem>>, vector<1x128xf32>
    %32 = vector.broadcast %31 : vector<1x128xf32> to vector<16x128xf32>
    %33 = arith.addf %30, %32 : vector<16x128xf32>
    %cst_25 = arith.constant 0.000000e+00 : f32
    %34 = vector.broadcast %cst_25 : f32 to vector<16x128xf32>
    %35 = arith.maximumf %33, %34 : vector<16x128xf32>
    %36 = arith.truncf %35 : vector<16x128xf32> to vector<16x128xbf16>
    %c0_26 = arith.constant 0 : index
    %c0_27 = arith.constant 0 : index
    %37 = vector.load %arg11[%c0_26, %c0_27] : memref<128x128xbf16, #tpu.memory_space<vmem>>, vector<128x128xbf16>
    %cst_28 = arith.constant dense<0.000000e+00> : vector<16x128xf32>
    %38 = tpu.matmul %36, %37, %cst_28 {dimension_numbers = #tpu.dot_dimension_numbers<[1], [0], [0], [1], [0, 0, 1, 1], [], []>} : vector<16x128xbf16>, vector<128x128xbf16>, vector<16x128xf32> -> vector<16x128xf32>
    %c0_29 = arith.constant 0 : index
    %c0_30 = arith.constant 0 : index
    %39 = vector.load %arg12[%c0_29, %c0_30] : memref<1x128xf32, #tpu.memory_space<vmem>>, vector<1x128xf32>
    %40 = vector.broadcast %39 : vector<1x128xf32> to vector<16x128xf32>
    %41 = arith.addf %38, %40 : vector<16x128xf32>
    %cst_31 = arith.constant 0.000000e+00 : f32
    %42 = vector.broadcast %cst_31 : f32 to vector<16x128xf32>
    %43 = arith.maximumf %41, %42 : vector<16x128xf32>
    %44 = arith.truncf %43 : vector<16x128xf32> to vector<16x128xbf16>
    %c0_32 = arith.constant 0 : index
    %c0_33 = arith.constant 0 : index
    %45 = vector.load %arg13[%c0_32, %c0_33] : memref<128x128xbf16, #tpu.memory_space<vmem>>, vector<128x128xbf16>
    %cst_34 = arith.constant dense<0.000000e+00> : vector<16x128xf32>
    %46 = tpu.matmul %44, %45, %cst_34 {dimension_numbers = #tpu.dot_dimension_numbers<[1], [0], [0], [1], [0, 0, 1, 1], [], []>} : vector<16x128xbf16>, vector<128x128xbf16>, vector<16x128xf32> -> vector<16x128xf32>
    %c0_35 = arith.constant 0 : index
    %c0_36 = arith.constant 0 : index
    %47 = vector.load %arg14[%c0_35, %c0_36] : memref<1x128xf32, #tpu.memory_space<vmem>>, vector<1x128xf32>
    %48 = vector.broadcast %47 : vector<1x128xf32> to vector<16x128xf32>
    %49 = arith.addf %46, %48 : vector<16x128xf32>
    %50 = vector.extract_strided_slice %49 {offsets = [0, 0], sizes = [16, 1], strides = [1, 1]} : vector<16x128xf32> to vector<16x1xf32>
    %c0_37 = arith.constant 0 : index
    %c0_38 = arith.constant 0 : index
    %51 = vector.load %arg15[%c0_37, %c0_38] : memref<16x1xf32, #tpu.memory_space<vmem>>, vector<16x1xf32>
    tpu.vector_store %arg15[%c0_37, %c0_38], %50 {strides = array<i32>} : memref<16x1xf32, #tpu.memory_space<vmem>>, vector<16x1xf32>,
    return
  }
  func.func @transform_0(%arg0: i32) -> (i32, i32) {
    %c0_i32 = arith.constant 0 : i32
    %c0_i32_0 = arith.constant 0 : i32
    return %arg0, %c0_i32 : i32, i32
  }
  func.func @transform_1(%arg0: i32) -> (i32, i32) {
    %c0_i32 = arith.constant 0 : i32
    %c0_i32_0 = arith.constant 0 : i32
    %c0_i32_1 = arith.constant 0 : i32
    return %c0_i32, %c0_i32_0 : i32, i32
  }
  func.func @transform_2(%arg0: i32) -> (i32, i32) {
    %c0_i32 = arith.constant 0 : i32
    %c0_i32_0 = arith.constant 0 : i32
    %c0_i32_1 = arith.constant 0 : i32
    return %c0_i32, %c0_i32_0 : i32, i32
  }
  func.func @transform_3(%arg0: i32) -> (i32, i32) {
    %c0_i32 = arith.constant 0 : i32
    %c0_i32_0 = arith.constant 0 : i32
    %c0_i32_1 = arith.constant 0 : i32
    return %c0_i32, %c0_i32_0 : i32, i32
  }
  func.func @transform_4(%arg0: i32) -> (i32, i32) {
    %c0_i32 = arith.constant 0 : i32
    %c0_i32_0 = arith.constant 0 : i32
    %c0_i32_1 = arith.constant 0 : i32
    return %c0_i32, %c0_i32_0 : i32, i32
  }
  func.func @transform_5(%arg0: i32) -> (i32, i32) {
    %c0_i32 = arith.constant 0 : i32
    %c0_i32_0 = arith.constant 0 : i32
    %c0_i32_1 = arith.constant 0 : i32
    return %c0_i32, %c0_i32_0 : i32, i32
  }
  func.func @transform_6(%arg0: i32) -> (i32, i32) {
    %c0_i32 = arith.constant 0 : i32
    %c0_i32_0 = arith.constant 0 : i32
    %c0_i32_1 = arith.constant 0 : i32
    return %c0_i32, %c0_i32_0 : i32, i32
  }
  func.func @transform_7(%arg0: i32) -> (i32, i32) {
    %c0_i32 = arith.constant 0 : i32
    %c0_i32_0 = arith.constant 0 : i32
    %c0_i32_1 = arith.constant 0 : i32
    return %c0_i32, %c0_i32_0 : i32, i32
  }
  func.func @transform_8(%arg0: i32) -> (i32, i32) {
    %c0_i32 = arith.constant 0 : i32
    %c0_i32_0 = arith.constant 0 : i32
    %c0_i32_1 = arith.constant 0 : i32
    return %c0_i32, %c0_i32_0 : i32, i32
  }
  func.func @transform_9(%arg0: i32) -> (i32, i32) {
    %c0_i32 = arith.constant 0 : i32
    %c0_i32_0 = arith.constant 0 : i32
    %c0_i32_1 = arith.constant 0 : i32
    return %c0_i32, %c0_i32_0 : i32, i32
  }
  func.func @transform_10(%arg0: i32) -> (i32, i32) {
    %c0_i32 = arith.constant 0 : i32
    %c0_i32_0 = arith.constant 0 : i32
    %c0_i32_1 = arith.constant 0 : i32
    return %c0_i32, %c0_i32_0 : i32, i32
  }
  func.func @transform_11(%arg0: i32) -> (i32, i32) {
    %c0_i32 = arith.constant 0 : i32
    %c0_i32_0 = arith.constant 0 : i32
    %c0_i32_1 = arith.constant 0 : i32
    return %c0_i32, %c0_i32_0 : i32, i32
  }
  func.func @transform_12(%arg0: i32) -> (i32, i32) {
    %c0_i32 = arith.constant 0 : i32
    %c0_i32_0 = arith.constant 0 : i32
    %c0_i32_1 = arith.constant 0 : i32
    return %c0_i32, %c0_i32_0 : i32, i32
  }
  func.func @transform_13(%arg0: i32) -> (i32, i32) {
    %c0_i32 = arith.constant 0 : i32
    %c0_i32_0 = arith.constant 0 : i32
    %c0_i32_1 = arith.constant 0 : i32
    return %c0_i32, %c0_i32_0 : i32, i32
  }
  func.func @transform_14(%arg0: i32) -> (i32, i32) {
    %c0_i32 = arith.constant 0 : i32
    %c0_i32_0 = arith.constant 0 : i32
    return %arg0, %c0_i32 : i32, i32
  }
}

</mosaic_0001>

<bundles_post_ra>
// kernel: _forward.1
= control target key start
LH: loop header
LB: loop body
LE: loop exit
PB: predicated region body
PF: predicated region fallthrough
CT: control target
= control target key end

     0   :  { %19 = vsyncpa [#allocation3], 0  ;;  %s2964_s0 = inlined_call_operand.vmem [shape: bf16[16,128], index: 0, kind: input, shape index: {}]   ;;  %s2965_s1 = inlined_call_operand.hbm [shape: bf16[128,768], index: 1, kind: input, shape index: {}]   ;;  %s2966_s2 = inlined_call_operand.hbm [shape: f32[1,768], index: 2, kind: input, shape index: {}]   ;;  %s2967_s3 = inlined_call_operand.hbm [shape: bf16[512,256], index: 3, kind: input, shape index: {}]   ;;  %s2968_s4 = inlined_call_operand.vmem [shape: f32[1,256], index: 4, kind: input, shape index: {}]   ;;  %s2969_s5 = inlined_call_operand.hbm [shape: bf16[256,128], index: 5, kind: input, shape index: {}]   ;;  %s2970_s6 = inlined_call_operand.vmem [shape: f32[1,128], index: 6, kind: input, shape index: {}]   ;;  %s2971_s7 = inlined_call_operand.hbm [shape: bf16[128,128], index: 7, kind: input, shape index: {}]   ;;  %s2972_s8 = inlined_call_operand.hbm [shape: bf16[256,128], index: 8, kind: input, shape index: {}]   ;;  %s2973_s9 = inlined_call_operand.hbm [shape: f32[1,128], index: 9, kind: input, shape index: {}]   ;;  %s2974_s10 = inlined_call_operand.hbm [shape: bf16[128,128], index: 10, kind: input, shape index: {}]   ;;  %s2975_s11 = inlined_call_operand.hbm [shape: f32[1,128], index: 11, kind: input, shape index: {}]   ;;  %s2976_s12 = inlined_call_operand.vmem [shape: bf16[128,128], index: 12, kind: input, shape index: {}]   ;;  %s2977_s13 = inlined_call_operand.hbm [shape: f32[1,128], index: 13, kind: input, shape index: {}]   ;;  %s2978_s14 = inlined_call_operand.vmem [shape: f32[16,1], index: 14, kind: output, shape index: {}]  }
   0x1   :  { %20 = vsyncpa [#allocation5], 0 }
   0x2   :  { %21 = vsyncpa [#allocation8], 0 }
   0x3   :  { %22 = vsyncpa [#allocation11], 0 }
   0x4   :  { %23 = vsyncpa [#allocation14], 0 }
   0x5   :  { %24 = vsyncpa [#allocation17], 0  ;;  %s2626_s29 = smov [#allocation4]   ;;  %s2627_s15 = smov [#allocation7]  }
   0x6   :  { %s45_s30 = sshll.u32 %s2626_s29, 4  ;;  %s68_s16 = sshll.u32 %s2627_s15, 4  ;;  %s46_s30 = int_to_ptr.vmem [resolvable:$true] %s45_s30  ;;  %s2720_s16 = int_to_ptr.vmem [resolvable:$true] %s68_s16 }
   0x7   :  { %s2394_s19 = scalar_lea.hbm %s2966_s2, 96 }
   0x8   :  { %p2395_p0 = scmp.ne.s32.totalorder %s2966_s2, %s2394_s19  ;;  %p2398_p1 = scmp.lt.u32.totalorder %s2394_s19, %s2966_s2 }
   0xa   :  { %p2400_p2 = pnand %p2398_p1, %p2395_p0 }
   0xc   :  { %2403 = shalt.err (!%p2400_p2)
}
   0xd   :  { %s2404_s24 = scalar_lea.vmem %s46_s30, 96  ;;  %p2409_p4 = scmp.lt.s32.totalorder %s46_s30, %s46_s30 }
   0xe   :  { %p2405_p3 = scmp.ne.s32.totalorder %s46_s30, %s2404_s24  ;;  %p2410_p5 = scmp.lt.s32.totalorder %s2404_s24, %s2404_s24 }
  0x10   :  { %p2411_p6 = por %p2410_p5, %p2409_p4 }
  0x12   :  { %p2412_p7 = pnand %p2411_p6, %p2405_p3 }
  0x14   :  { %2415 = shalt.err (!%p2412_p7)
}
  0x15   :  { %48 = dma.hbm_to_vmem [thread:$0]  %s2966_s2, 96, %s46_s30, [#allocation5]  }
  0x16   :  { %s2416_s29 = scalar_lea.hbm %s2969_s5, 2048 }
  0x17   :  { %p2417_p8 = scmp.ne.s32.totalorder %s2969_s5, %s2416_s29  ;;  %p2420_p9 = scmp.lt.u32.totalorder %s2416_s29, %s2969_s5 }
  0x19   :  { %p2422_p10 = pnand %p2420_p9, %p2417_p8 }
  0x1b   :  { %2425 = shalt.err (!%p2422_p10)
}
  0x1c   :  { %s2426_s20 = scalar_lea.vmem %s2720_s16, 2048  ;;  %p2431_p12 = scmp.lt.s32.totalorder %s2720_s16, %s2720_s16 }
  0x1d   :  { %p2427_p11 = scmp.ne.s32.totalorder %s2720_s16, %s2426_s20  ;;  %p2432_p13 = scmp.lt.s32.totalorder %s2426_s20, %s2426_s20 }
  0x1f   :  { %p2433_p0 = por %p2432_p13, %p2431_p12 }
  0x21   :  { %p2434_p1 = pnand %p2433_p0, %p2427_p11 }
  0x23   :  { %2437 = shalt.err (!%p2434_p1)
}
  0x24   :  { %s2628_s2 = smov 64   ;;  %s2629_s30 = smov 4  }
  0x25   :  { %74 = dma.hbm_to_vmem [thread:$0]  %s2969_s5, 2048, %s2720_s16, [#allocation8], %s2628_s2, %s2628_s2, %s2629_s30  }
  0x26   :  { %s2630_s23 = smov [#allocation10]   ;;  %s2631_s25 = smov [#allocation13]  }
  0x27   :  { %s94_s24 = sshll.u32 %s2630_s23, 4  ;;  %s116_s26 = sshll.u32 %s2631_s25, 4  ;;  %s95_s24 = int_to_ptr.vmem [resolvable:$true] %s94_s24  ;;  %s2754_s26 = int_to_ptr.vmem [resolvable:$true] %s116_s26 }
  0x28   :  { %s2438_s29 = scalar_lea.hbm %s2972_s8, 2048 }
  0x29   :  { %p2439_p2 = scmp.ne.s32.totalorder %s2972_s8, %s2438_s29  ;;  %p2442_p3 = scmp.lt.u32.totalorder %s2438_s29, %s2972_s8 }
  0x2b   :  { %p2444_p4 = pnand %p2442_p3, %p2439_p2 }
  0x2d   :  { %2447 = shalt.err (!%p2444_p4)
}
  0x2e   :  { %s2448_s5 = scalar_lea.vmem %s95_s24, 2048  ;;  %p2453_p6 = scmp.lt.s32.totalorder %s95_s24, %s95_s24 }
  0x2f   :  { %p2449_p5 = scmp.ne.s32.totalorder %s95_s24, %s2448_s5  ;;  %p2454_p7 = scmp.lt.s32.totalorder %s2448_s5, %s2448_s5 }
  0x31   :  { %p2455_p8 = por %p2454_p7, %p2453_p6 }
  0x33   :  { %p2456_p9 = pnand %p2455_p8, %p2449_p5 }
  0x35   :  { %2459 = shalt.err (!%p2456_p9)
}
  0x36   :  { %100 = dma.hbm_to_vmem [thread:$0]  %s2972_s8, 2048, %s95_s24, [#allocation11], %s2628_s2, %s2628_s2, %s2629_s30  }
  0x37   :  { %s2460_s23 = scalar_lea.hbm %s2974_s10, 1024 }
  0x38   :  { %p2461_p10 = scmp.ne.s32.totalorder %s2974_s10, %s2460_s23  ;;  %p2464_p11 = scmp.lt.u32.totalorder %s2460_s23, %s2974_s10 }
  0x3a   :  { %p2466_p12 = pnand %p2464_p11, %p2461_p10 }
  0x3c   :  { %2469 = shalt.err (!%p2466_p12)
}
  0x3d   :  { %s2470_s15 = scalar_lea.vmem %s2754_s26, 1024  ;;  %p2475_p0 = scmp.lt.s32.totalorder %s2754_s26, %s2754_s26 }
  0x3e   :  { %p2471_p13 = scmp.ne.s32.totalorder %s2754_s26, %s2470_s15  ;;  %p2476_p1 = scmp.lt.s32.totalorder %s2470_s15, %s2470_s15 }
  0x40   :  { %p2477_p2 = por %p2476_p1, %p2475_p0 }
  0x42   :  { %p2478_p3 = pnand %p2477_p2, %p2471_p13 }
  0x44   :  { %2481 = shalt.err (!%p2478_p3)
}
  0x45   :  { %122 = dma.hbm_to_vmem [thread:$0]  %s2974_s10, 1024, %s2754_s26, [#allocation14], %s2628_s2, %s2628_s2, %s2629_s30  }
  0x46   :  { %s2632_s17 = smov [#allocation2]   ;;  %s2482_s16 = scalar_lea.hbm %s2965_s1, 6144 }
  0x47   :  { %s32_s18 = sshll.u32 %s2632_s17, 4  ;;  %p2483_p4 = scmp.ne.s32.totalorder %s2965_s1, %s2482_s16  ;;  %s33_s18 = int_to_ptr.vmem [resolvable:$true] %s32_s18 }
  0x48   :  { %p2486_p5 = scmp.lt.u32.totalorder %s2482_s16, %s2965_s1 }
  0x4a   :  { %p2488_p6 = pnand %p2486_p5, %p2483_p4 }
  0x4c   :  { %2491 = shalt.err (!%p2488_p6)
}
  0x4d   :  { %s2492_s25 = scalar_lea.vmem %s33_s18, 6144  ;;  %p2497_p8 = scmp.lt.s32.totalorder %s33_s18, %s33_s18 }
  0x4e   :  { %p2493_p7 = scmp.ne.s32.totalorder %s33_s18, %s2492_s25  ;;  %p2498_p9 = scmp.lt.s32.totalorder %s2492_s25, %s2492_s25 }
  0x50   :  { %p2499_p10 = por %p2498_p9, %p2497_p8 }
  0x52   :  { %p2500_p11 = pnand %p2499_p10, %p2493_p7 }
  0x54   :  { %2503 = shalt.err (!%p2500_p11)
}
  0x55   :  { %s2633_s10 = smov 384   ;;  %s2634_s26 = smov 24  }
  0x56   :  { %38 = dma.hbm_to_vmem [thread:$0]  %s2965_s1, 6144, %s33_s18, [#allocation3], %s2633_s10, %s2633_s10, %s2634_s26  }
  0x57   :  { %s2635_s29 = smov [#allocation6]   ;;  %s2504_s17 = scalar_lea.hbm %s2967_s3, 8192 }
  0x58   :  { %s54_s15 = sshll.u32 %s2635_s29, 4  ;;  %p2505_p12 = scmp.ne.s32.totalorder %s2967_s3, %s2504_s17  ;;  %s55_s15 = int_to_ptr.vmem [resolvable:$true] %s54_s15 }
  0x59   :  { %p2508_p13 = scmp.lt.u32.totalorder %s2504_s17, %s2967_s3 }
  0x5b   :  { %p2510_p0 = pnand %p2508_p13, %p2505_p12 }
  0x5d   :  { %2513 = shalt.err (!%p2510_p0)
}
  0x5e   :  { %s2514_s21 = scalar_lea.vmem %s55_s15, 8192  ;;  %p2519_p2 = scmp.lt.s32.totalorder %s55_s15, %s55_s15 }
  0x5f   :  { %p2515_p1 = scmp.ne.s32.totalorder %s55_s15, %s2514_s21  ;;  %p2520_p3 = scmp.lt.s32.totalorder %s2514_s21, %s2514_s21 }
  0x61   :  { %p2521_p4 = por %p2520_p3, %p2519_p2 }
  0x63   :  { %p2522_p5 = pnand %p2521_p4, %p2515_p1 }
  0x65   :  { %2525 = shalt.err (!%p2522_p5)
}
  0x66   :  { %s2636_s1 = smov 128   ;;  %s2637_s18 = smov 8  }
  0x67   :  { %60 = dma.hbm_to_vmem [thread:$0]  %s2967_s3, 8192, %s55_s15, [#allocation5], %s2636_s1, %s2636_s1, %s2637_s18  }
  0x68   :  { %s2638_s25 = smov [#allocation9]   ;;  %s2639_s26 = smov [#allocation12]  }
  0x69   :  { %s82_s10 = sshll.u32 %s2638_s25, 4  ;;  %s107_s27 = sshll.u32 %s2639_s26, 4  ;;  %s83_s10 = int_to_ptr.vmem [resolvable:$true] %s82_s10  ;;  %s108_s27 = int_to_ptr.vmem [resolvable:$true] %s107_s27 }
  0x6a   :  { %s2526_s8 = scalar_lea.hbm %s2971_s7, 1024 }
  0x6b   :  { %p2527_p6 = scmp.ne.s32.totalorder %s2971_s7, %s2526_s8  ;;  %p2530_p7 = scmp.lt.u32.totalorder %s2526_s8, %s2971_s7 }
  0x6d   :  { %p2532_p8 = pnand %p2530_p7, %p2527_p6 }
  0x6f   :  { %2535 = shalt.err (!%p2532_p8)
}
  0x70   :  { %s2536_s3 = scalar_lea.vmem %s83_s10, 1024  ;;  %p2541_p10 = scmp.lt.s32.totalorder %s83_s10, %s83_s10 }
  0x71   :  { %p2537_p9 = scmp.ne.s32.totalorder %s83_s10, %s2536_s3  ;;  %p2542_p11 = scmp.lt.s32.totalorder %s2536_s3, %s2536_s3 }
  0x73   :  { %p2543_p12 = por %p2542_p11, %p2541_p10 }
  0x75   :  { %p2544_p13 = pnand %p2543_p12, %p2537_p9 }
  0x77   :  { %2547 = shalt.err (!%p2544_p13)
}
  0x78   :  { %88 = dma.hbm_to_vmem [thread:$0]  %s2971_s7, 1024, %s83_s10, [#allocation8], %s2628_s2, %s2628_s2, %s2629_s30  }
  0x79   :  { %s2548_s1 = scalar_lea.hbm %s2973_s9, 16 }
  0x7a   :  { %p2549_p0 = scmp.ne.s32.totalorder %s2973_s9, %s2548_s1  ;;  %p2552_p1 = scmp.lt.u32.totalorder %s2548_s1, %s2973_s9 }
  0x7c   :  { %p2554_p2 = pnand %p2552_p1, %p2549_p0 }
  0x7e   :  { %2557 = shalt.err (!%p2554_p2)
}
  0x7f   :  { %s2558_s26 = scalar_lea.vmem %s108_s27, 16  ;;  %s2562_s28 = scalar_lea.vmem %s108_s27, 32 }
  0x80   :  { %p2559_p3 = scmp.ne.s32.totalorder %s108_s27, %s2558_s26  ;;  %p2563_p4 = scmp.lt.s32.totalorder %s108_s27, %s108_s27 }
  0x81   :  { %p2564_p5 = scmp.lt.s32.totalorder %s2562_s28, %s2558_s26 }
  0x83   :  { %p2565_p6 = por %p2564_p5, %p2563_p4 }
  0x85   :  { %p2566_p7 = pnand %p2565_p6, %p2559_p3 }
  0x87   :  { %2569 = shalt.err (!%p2566_p7)
}
  0x88   :  { %110 = dma.hbm_to_vmem [thread:$0]  %s2973_s9, 16, %s108_s27, [#allocation11]  }
  0x89   :  { %s2640_s30 = smov [#allocation15]   ;;  %s2641_s29 = smov [#allocation16]  }
  0x8a   :  { %s129_s10 = sshll.u32 %s2640_s30, 4  ;;  %s141_s8 = sshll.u32 %s2641_s29, 4  ;;  %s130_s10 = int_to_ptr.vmem [resolvable:$true] %s129_s10  ;;  %s142_s8 = int_to_ptr.vmem [resolvable:$true] %s141_s8 }
  0x8b   :  { %s2570_s19 = scalar_lea.hbm %s2975_s11, 16 }
  0x8c   :  { %p2571_p8 = scmp.ne.s32.totalorder %s2975_s11, %s2570_s19  ;;  %p2574_p9 = scmp.lt.u32.totalorder %s2570_s19, %s2975_s11 }
  0x8e   :  { %p2576_p10 = pnand %p2574_p9, %p2571_p8 }
  0x90   :  { %2579 = shalt.err (!%p2576_p10)
}
  0x91   :  { %s2580_s9 = scalar_lea.vmem %s130_s10, 16  ;;  %s2584_s27 = scalar_lea.vmem %s130_s10, 32 }
  0x92   :  { %p2581_p11 = scmp.ne.s32.totalorder %s130_s10, %s2580_s9  ;;  %p2585_p12 = scmp.lt.s32.totalorder %s130_s10, %s130_s10 }
  0x93   :  { %p2586_p13 = scmp.lt.s32.totalorder %s2584_s27, %s2580_s9 }
  0x95   :  { %p2587_p0 = por %p2586_p13, %p2585_p12 }
  0x97   :  { %p2588_p1 = pnand %p2587_p0, %p2581_p11 }
  0x99   :  { %2591 = shalt.err (!%p2588_p1)
}
  0x9a   :  { %132 = dma.hbm_to_vmem [thread:$0]  %s2975_s11, 16, %s130_s10, [#allocation14]  }
  0x9b   :  { %s2592_s22 = scalar_lea.hbm %s2977_s13, 16 }
  0x9c   :  { %p2593_p2 = scmp.ne.s32.totalorder %s2977_s13, %s2592_s22  ;;  %p2596_p3 = scmp.lt.u32.totalorder %s2592_s22, %s2977_s13 }
  0x9e   :  { %p2598_p4 = pnand %p2596_p3, %p2593_p2 }
  0xa0   :  { %2601 = shalt.err (!%p2598_p4)
}
  0xa1   :  { %s2602_s7 = scalar_lea.vmem %s142_s8, 16  ;;  %s2606_s2 = scalar_lea.vmem %s142_s8, 32 }
  0xa2   :  { %p2603_p5 = scmp.ne.s32.totalorder %s142_s8, %s2602_s7  ;;  %p2607_p6 = scmp.lt.s32.totalorder %s142_s8, %s142_s8 }
  0xa3   :  { %p2608_p7 = scmp.lt.s32.totalorder %s2606_s2, %s2602_s7 }
  0xa5   :  { %p2609_p8 = por %p2608_p7, %p2607_p6 }
  0xa7   :  { %p2610_p9 = pnand %p2609_p8, %p2603_p5 }
  0xa9   :  { %2613 = shalt.err (!%p2610_p9)
}
  0xaa   :  { %144 = dma.hbm_to_vmem [thread:$0]  %s2977_s13, 16, %s142_s8, [#allocation17]  }
  0xab   :  { %2614 = dma.done.wait [#allocation3], 6144  }
  0xac   :  { %2615 = vsyncadd [#allocation3], 4294961152 }
  0xad   :  { %2616 = dma.done.wait [#allocation5], 8288  }
  0xae   :  { %2617 = vsyncadd [#allocation5], 4294959008 }
  0xaf   :  { %2618 = dma.done.wait [#allocation8], 3072  }
  0xb0   :  { %2619 = vsyncadd [#allocation8], 4294964224 }
  0xb1   :  { %2620 = dma.done.wait [#allocation11], 2064  }
  0xb2   :  { %2621 = vsyncadd [#allocation11], 4294965232 }
  0xb3   :  { %2622 = dma.done.wait [#allocation14], 1040  }
  0xb4   :  { %2623 = vsyncadd [#allocation14], 4294966256 }
  0xb5   :  { %2624 = dma.done.wait [#allocation17], 16  }
  0xb6   :  { %2625 = vsyncadd [#allocation17], 4294967280  ;;  %v2642_v0 = vmov 0   ;;  %v2169_v1 = vld [vmem:[#allocation2 + $0x4] ss:$24 sps:$4 sm:$0xff]   ;;  %vm2644_vm0 = vmmov 0  }
  0xb7   :  { %536 = vmatprep.mubr.bf16.mxu0 %v2642_v0  ;;  %579 = vmatprep.mubr.bf16.mxu1 %v2642_v0  ;;  %v2171_v2 = vld [vmem:[#allocation2] ss:$24 sps:$4 sm:$0xff]   ;;  %v2172_v3 = vld [vmem:[#allocation2 + $0x34] ss:$24 sps:$4 sm:$0xff]   ;;  %v2174_v4 = vld [vmem:[#allocation2 + $0x30] ss:$24 sps:$4 sm:$0xff]  }
  0xb8   :  { %504 = vmatprep.subr.bf16.mxu0 %v2169_v1  ;;  %v2175_v5 = vld [vmem:[#allocation2 + $0x64] ss:$24 sps:$4 sm:$0xff]   ;;  %v2177_v6 = vld [vmem:[#allocation2 + $0x60] ss:$24 sps:$4 sm:$0xff]   ;;  %v2178_v7 = vld [vmem:[#allocation2 + $0x94] ss:$24 sps:$4 sm:$0xff]  }
  0xb9   :  { %505 = vmatpush1.bf16.msra.mxu0 %v2171_v2  ;;  %v2180_v8 = vld [vmem:[#allocation2 + $0x90] ss:$24 sps:$4 sm:$0xff]   ;;  %v2181_v9 = vld [vmem:[#allocation2 + $0xc4] ss:$24 sps:$4 sm:$0xff]   ;;  %v2183_v13 = vld [vmem:[#allocation2 + $0xc0] ss:$24 sps:$4 sm:$0xff]  }
  0xba   :  { %506 = vmatprep.subr.bf16.mxu0 %v2172_v3  ;;  %v2194_v10 = vld [vmem:[#allocation2 + $0xc] ss:$24 sps:$4 sm:$0xff]   ;;  %v2196_v11 = vld [vmem:[#allocation2 + $0x8] ss:$24 sps:$4 sm:$0xff]   ;;  %v2197_v12 = vld [vmem:[#allocation2 + $0x3c] ss:$24 sps:$4 sm:$0xff]  }
  0xbb   :  { %547 = vmatprep.subr.bf16.mxu1 %v2194_v10  ;;  %v2199_v14 = vld [vmem:[#allocation2 + $0x38] ss:$24 sps:$4 sm:$0xff]   ;;  %v2184_v15 = vld [vmem:[#allocation2 + $0xf4] ss:$24 sps:$4 sm:$0xff]   ;;  %v2202_v18 = vld [vmem:[#allocation2 + $0x68] ss:$24 sps:$4 sm:$0xff]  }
  0xbc   :  { %548 = vmatpush1.bf16.msra.mxu1 %v2196_v11  ;;  %v2200_v16 = vld [vmem:[#allocation2 + $0x6c] ss:$24 sps:$4 sm:$0xff]   ;;  %v2186_v17 = vld [vmem:[#allocation2 + $0xf0] ss:$24 sps:$4 sm:$0xff]   ;;  %v2203_v20 = vld [vmem:[#allocation2 + $0x9c] ss:$24 sps:$4 sm:$0xff]  }
  0xbd   :  { %507 = vmatpush1.bf16.msra.mxu0 %v2174_v4  ;;  %549 = vmatprep.subr.bf16.mxu1 %v2197_v12  ;;  %v2187_v19 = vld [vmem:[#allocation2 + $0x124] ss:$24 sps:$4 sm:$0xff]   ;;  %v2189_v21 = vld [vmem:[#allocation2 + $0x120] ss:$24 sps:$4 sm:$0xff]   ;;  %v2190_v23 = vld [vmem:[#allocation2 + $0x154] ss:$24 sps:$4 sm:$0xff]  }
  0xbe   :  { %508 = vmatprep.subr.bf16.mxu0 %v2175_v5  ;;  %v2205_v22 = vld [vmem:[#allocation2 + $0x98] ss:$24 sps:$4 sm:$0xff]   ;;  %v2206_v24 = vld [vmem:[#allocation2 + $0xcc] ss:$24 sps:$4 sm:$0xff]   ;;  %v2208_v26 = vld [vmem:[#allocation2 + $0xc8] ss:$24 sps:$4 sm:$0xff]  }
  0xbf   :  { %v2192_v25 = vld [vmem:[#allocation2 + $0x150] ss:$24 sps:$4 sm:$0xff]   ;;  %v2209_v27 = vld [vmem:[#allocation2 + $0xfc] ss:$24 sps:$4 sm:$0xff]   ;;  %v2869_v28 = vld [vmem:[%s2964_s0] sm:$0xff]   ;;  %vm1825_vm1 = vcmask 7168  }
  0xc0   :  { %550 = vmatpush1.bf16.msra.mxu1 %v2199_v14  ;;  %v2211_v29 = vld [vmem:[#allocation2 + $0xf8] ss:$24 sps:$4 sm:$0xff]   ;;  %v2212_v30 = vld [vmem:[#allocation2 + $0x12c] ss:$24 sps:$4 sm:$0xff]   ;;  %v2214_v31 = vld [vmem:[#allocation2 + $0x128] ss:$24 sps:$4 sm:$0xff]  }
  0xc1   :  { %509 = vmatpush1.bf16.msra.mxu0 %v2177_v6  ;;  %551 = vmatprep.subr.bf16.mxu1 %v2200_v16  ;;  %v2215_v32 = vld [vmem:[#allocation2 + $0x15c] ss:$24 sps:$4 sm:$0xff]   ;;  %v2217_v33 = vld [vmem:[#allocation2 + $0x158] ss:$24 sps:$4 sm:$0xff]  }
  0xc2   :  { %510 = vmatprep.subr.bf16.mxu0 %v2178_v7  ;;  %v2220_v34 = vld [vmem:[#allocation6 + $0x4] ss:$8 sps:$4 sm:$0xff]   ;;  %v2218_v35 = vld [vmem:[#allocation6] ss:$8 sps:$4 sm:$0xff]   ;;  %v2223_v36 = vld [vmem:[#allocation6 + $0x14] ss:$8 sps:$4 sm:$0xff]  }
  0xc3   :  { %v2221_v37 = vld [vmem:[#allocation6 + $0x10] ss:$8 sps:$4 sm:$0xff]   ;;  %v2226_v38 = vld [vmem:[#allocation6 + $0x24] ss:$8 sps:$4 sm:$0xff]   ;;  %v2224_v39 = vld [vmem:[#allocation6 + $0x20] ss:$8 sps:$4 sm:$0xff]  }
  0xc4   :  { %552 = vmatpush1.bf16.msra.mxu1 %v2202_v18  ;;  %v2229_v40 = vld [vmem:[#allocation6 + $0x34] ss:$8 sps:$4 sm:$0xff]   ;;  %v2227_v41 = vld [vmem:[#allocation6 + $0x30] ss:$8 sps:$4 sm:$0xff]   ;;  %v2232_v42 = vld [vmem:[#allocation6 + $0x44] ss:$8 sps:$4 sm:$0xff]  }
  0xc5   :  { %511 = vmatpush1.bf16.msra.mxu0 %v2180_v8  ;;  %553 = vmatprep.subr.bf16.mxu1 %v2203_v20  ;;  %v2230_v43 = vld [vmem:[#allocation6 + $0x40] ss:$8 sps:$4 sm:$0xff]   ;;  %v2235_v44 = vld [vmem:[#allocation6 + $0x54] ss:$8 sps:$4 sm:$0xff]   ;;  %v2233_v45 = vld [vmem:[#allocation6 + $0x50] ss:$8 sps:$4 sm:$0xff]  }
  0xc6   :  { %512 = vmatprep.subr.bf16.mxu0 %v2181_v9  ;;  %v2238_v46 = vld [vmem:[#allocation6 + $0x64] ss:$8 sps:$4 sm:$0xff]   ;;  %v2236_v47 = vld [vmem:[#allocation6 + $0x60] ss:$8 sps:$4 sm:$0xff]   ;;  %v2241_v48 = vld [vmem:[#allocation6 + $0x74] ss:$8 sps:$4 sm:$0xff]  }
  0xc7   :  { %v2239_v49 = vld [vmem:[#allocation6 + $0x70] ss:$8 sps:$4 sm:$0xff]   ;;  %v2244_v50 = vld [vmem:[#allocation6 + $0x84] ss:$8 sps:$4 sm:$0xff]   ;;  %v2242_v51 = vld [vmem:[#allocation6 + $0x80] ss:$8 sps:$4 sm:$0xff]  }
  0xc8   :  { %554 = vmatpush1.bf16.msra.mxu1 %v2205_v22  ;;  %v2247_v52 = vld [vmem:[#allocation6 + $0x94] ss:$8 sps:$4 sm:$0xff]   ;;  %v2245_v53 = vld [vmem:[#allocation6 + $0x90] ss:$8 sps:$4 sm:$0xff]   ;;  %v2250_v54 = vld [vmem:[#allocation6 + $0xa4] ss:$8 sps:$4 sm:$0xff]  }
  0xc9   :  { %513 = vmatpush1.bf16.msra.mxu0 %v2183_v13  ;;  %555 = vmatprep.subr.bf16.mxu1 %v2206_v24  ;;  %v2248_v55 = vld [vmem:[#allocation6 + $0xa0] ss:$8 sps:$4 sm:$0xff]   ;;  %v2253_v56 = vld [vmem:[#allocation6 + $0xb4] ss:$8 sps:$4 sm:$0xff]   ;;  %v2251_v57 = vld [vmem:[#allocation6 + $0xb0] ss:$8 sps:$4 sm:$0xff]   ;;  %v228_v24 = vlaneseq }
  0xca   :  { %514 = vmatprep.subr.bf16.mxu0 %v2184_v15  ;;  %v2256_v58 = vld [vmem:[#allocation6 + $0xc4] ss:$8 sps:$4 sm:$0xff]   ;;  %v2254_v59 = vld [vmem:[#allocation6 + $0xc0] ss:$8 sps:$4 sm:$0xff]   ;;  %v2259_v60 = vld [vmem:[#allocation6 + $0xd4] ss:$8 sps:$4 sm:$0xff]  }
  0xcb   :  { %v2257_v61 = vld [vmem:[#allocation6 + $0xd0] ss:$8 sps:$4 sm:$0xff]   ;;  %v2262_v62 = vld [vmem:[#allocation6 + $0xe4] ss:$8 sps:$4 sm:$0xff]   ;;  %v2260_v63 = vld [vmem:[#allocation6 + $0xe0] ss:$8 sps:$4 sm:$0xff]  }
  0xcc   :  { %556 = vmatpush1.bf16.msra.mxu1 %v2208_v26  ;;  %v2263_v1 = vld [vmem:[#allocation6 + $0xf0] ss:$8 sps:$4 sm:$0xff]   ;;  %v2268_v2 = vld [vmem:[#allocation6 + $0x104] ss:$8 sps:$4 sm:$0xff]  }
  0xcd   :  { %515 = vmatpush1.bf16.msra.mxu0 %v2186_v17  ;;  %557 = vmatprep.subr.bf16.mxu1 %v2209_v27  ;;  %v2314_v3 = vld [vmem:[#allocation2 + $0x10] ss:$24 sps:$4 sm:$0xff]   ;;  %v2316_v4 = vld [vmem:[#allocation2 + $0x14] ss:$24 sps:$4 sm:$0xff]   ;;  %v2319_v5 = vld [vmem:[#allocation2 + $0x44] ss:$24 sps:$4 sm:$0xff]  }
  0xce   :  { %516 = vmatprep.subr.bf16.mxu0 %v2187_v19  ;;  %v2317_v6 = vld [vmem:[#allocation2 + $0x40] ss:$24 sps:$4 sm:$0xff]   ;;  %v2322_v7 = vld [vmem:[#allocation2 + $0x74] ss:$24 sps:$4 sm:$0xff]   ;;  %v2320_v8 = vld [vmem:[#allocation2 + $0x70] ss:$24 sps:$4 sm:$0xff]  }
  0xcf   :  { %v2325_v9 = vld [vmem:[#allocation2 + $0xa4] ss:$24 sps:$4 sm:$0xff]   ;;  %v2323_v10 = vld [vmem:[#allocation2 + $0xa0] ss:$24 sps:$4 sm:$0xff]   ;;  %v2328_v11 = vld [vmem:[#allocation2 + $0xd4] ss:$24 sps:$4 sm:$0xff]  }
  0xd0   :  { %558 = vmatpush1.bf16.msra.mxu1 %v2211_v29  ;;  %v2326_v12 = vld [vmem:[#allocation2 + $0xd0] ss:$24 sps:$4 sm:$0xff]   ;;  %v2331_v13 = vld [vmem:[#allocation2 + $0x104] ss:$24 sps:$4 sm:$0xff]   ;;  %v2329_v14 = vld [vmem:[#allocation2 + $0x100] ss:$24 sps:$4 sm:$0xff]  }
  0xd1   :  { %517 = vmatpush1.bf16.msra.mxu0 %v2189_v21  ;;  %559 = vmatprep.subr.bf16.mxu1 %v2212_v30  ;;  %v2334_v15 = vld [vmem:[#allocation2 + $0x134] ss:$24 sps:$4 sm:$0xff]   ;;  %v2332_v16 = vld [vmem:[#allocation2 + $0x130] ss:$24 sps:$4 sm:$0xff]   ;;  %v2337_v17 = vld [vmem:[#allocation2 + $0x164] ss:$24 sps:$4 sm:$0xff]  }
  0xd2   :  { %518 = vmatprep.subr.bf16.mxu0 %v2190_v23  ;;  %v2335_v18 = vld [vmem:[#allocation2 + $0x160] ss:$24 sps:$4 sm:$0xff]   ;;  %v2338_v19 = vld [vmem:[#allocation7 + $0x40] sm:$0xff]   ;;  %v2340_v21 = vld [vmem:[#allocation7 + $0x48] sm:$0xff]   ;;  %v2874_v27 = vshrl.u32 %v228_v24, 7 }
  0xd3   :  { %v2339_v20 = vld [vmem:[#allocation7] sm:$0xff]   ;;  %v2341_v22 = vld [vmem:[#allocation7 + $0x8] sm:$0xff]   ;;  %v2342_v23 = vld [vmem:[#allocation7 + $0x50] sm:$0xff]  }
  0xd4   :  { %560 = vmatpush1.bf16.msra.mxu1 %v2214_v31  ;;  %v2344_v26 = vld [vmem:[#allocation7 + $0x58] sm:$0xff]   ;;  %v2346_v30 = vld [vmem:[#allocation7 + $0x60] sm:$0xff]   ;;  %v230_v31 = vsub.s32 0, %v2874_v27 }
  0xd5   :  { %519 = vmatpush1.bf16.msra.mxu0 %v2192_v25  ;;  %561 = vmatprep.subr.bf16.mxu1 %v2215_v32  ;;  %v2343_v25 = vld [vmem:[#allocation7 + $0x10] sm:$0xff]   ;;  %v2345_v29 = vld [vmem:[#allocation7 + $0x18] sm:$0xff]   ;;  %v2298_v24 = vld [vmem:[#allocation6 + $0x1a4] ss:$8 sps:$4 sm:$0xff]  }
  0xd6   :  { %590 = vmatprep.subr.bf16.mxu0 %v2316_v4  ;;  %v2877_v32 = vld [vmem:[#allocation4] sm:$0x3f] }
  0xd8   :  { %537 = vmatmul.mubr.bf16.vlgmr.msra.gmra.mrb[0].mxu0 %v2869_v28  ;;  %562 = vmatpush1.bf16.msra.mxu1 %v2217_v33  ;;  %v2347_v33 = vld [vmem:[#allocation7 + $0x20] sm:$0xff]  }
  0xd9   :  { %622 = vmatprep.mubr.bf16.mxu0 %v2642_v0  ;;  %1043 = vmatprep.subr.bf16.mxu1 %v2220_v34  ;;  %v2265_v0 = vld [vmem:[#allocation6 + $0xf4] ss:$8 sps:$4 sm:$0xff]   ;;  %v2348_v34 = vld [vmem:[#allocation7 + $0x68] sm:$0xff]  }
  0xda   :  { %591 = vmatpush1.bf16.msra.mxu0 %v2314_v3  ;;  %v2272_v3 = vld [vmem:[#allocation6 + $0x120] ss:$8 sps:$4 sm:$0xff]  }
  0xdb   :  { %580 = vmatmul.mubr.bf16.vlgmr.msra.gmra.mrb[0].mxu1 %v2869_v28  ;;  %592 = vmatprep.subr.bf16.mxu0 %v2319_v5 }
  0xdc   :  { %1044 = vmatpush1.bf16.msra.mxu1 %v2218_v35  ;;  %v231_v35 = vrot.slane %v2877_v32, %v230_v31 }
  0xdd   :  { %1045 = vmatprep.subr.bf16.mxu1 %v2223_v36 }
  0xde   :  { %593 = vmatpush1.bf16.msra.mxu0 %v2317_v6  ;;  %v2277_v6 = vld [vmem:[#allocation6 + $0x134] ss:$8 sps:$4 sm:$0xff]  }
  0xdf   :  { %594 = vmatprep.subr.bf16.mxu0 %v2322_v7 }
  0xe0   :  { %1046 = vmatpush1.bf16.msra.mxu1 %v2221_v37 }
  0xe1   :  { %1047 = vmatprep.subr.bf16.mxu1 %v2226_v38 }
  0xe2   :  { %595 = vmatpush1.bf16.msra.mxu0 %v2320_v8 }
  0xe3   :  { %596 = vmatprep.subr.bf16.mxu0 %v2325_v9 }
  0xe4   :  { %1048 = vmatpush1.bf16.msra.mxu1 %v2224_v39 }
  0xe5   :  { %1049 = vmatprep.subr.bf16.mxu1 %v2229_v40 }
  0xe6   :  { %597 = vmatpush1.bf16.msra.mxu0 %v2323_v10  ;;  %v2275_v10 = vld [vmem:[#allocation6 + $0x130] ss:$8 sps:$4 sm:$0xff]  }
  0xe7   :  { %598 = vmatprep.subr.bf16.mxu0 %v2328_v11 }
  0xe8   :  { %1050 = vmatpush1.bf16.msra.mxu1 %v2227_v41 }
  0xe9   :  { %1051 = vmatprep.subr.bf16.mxu1 %v2232_v42 }
  0xea   :  { %599 = vmatpush1.bf16.msra.mxu0 %v2326_v12  ;;  %v2280_v12 = vld [vmem:[#allocation6 + $0x144] ss:$8 sps:$4 sm:$0xff]  }
  0xeb   :  { %600 = vmatprep.subr.bf16.mxu0 %v2331_v13  ;;  %v2278_v13 = vld [vmem:[#allocation6 + $0x140] ss:$8 sps:$4 sm:$0xff]  }
  0xec   :  { %1052 = vmatpush1.bf16.msra.mxu1 %v2230_v43 }
  0xed   :  { %1053 = vmatprep.subr.bf16.mxu1 %v2235_v44 }
  0xee   :  { %601 = vmatpush1.bf16.msra.mxu0 %v2329_v14  ;;  %v2283_v14 = vld [vmem:[#allocation6 + $0x154] ss:$8 sps:$4 sm:$0xff]  }
  0xef   :  { %602 = vmatprep.subr.bf16.mxu0 %v2334_v15  ;;  %v2281_v15 = vld [vmem:[#allocation6 + $0x150] ss:$8 sps:$4 sm:$0xff]  }
  0xf0   :  { %1054 = vmatpush1.bf16.msra.mxu1 %v2233_v45 }
  0xf1   :  { %1055 = vmatprep.subr.bf16.mxu1 %v2238_v46 }
  0xf2   :  { %603 = vmatpush1.bf16.msra.mxu0 %v2332_v16  ;;  %v2286_v16 = vld [vmem:[#allocation6 + $0x164] ss:$8 sps:$4 sm:$0xff]  }
  0xf3   :  { %604 = vmatprep.subr.bf16.mxu0 %v2337_v17  ;;  %v2284_v17 = vld [vmem:[#allocation6 + $0x160] ss:$8 sps:$4 sm:$0xff]  }
  0xf4   :  { %1056 = vmatpush1.bf16.msra.mxu1 %v2236_v47  ;;  %v238_v47 = vsub.s32 2, %v2874_v27 }
  0xf5   :  { %1057 = vmatprep.subr.bf16.mxu1 %v2241_v48 }
  0xf6   :  { %605 = vmatpush1.bf16.msra.mxu0 %v2335_v18  ;;  %v2289_v18 = vld [vmem:[#allocation6 + $0x174] ss:$8 sps:$4 sm:$0xff]  }
  0xf7   :  { %2011 = vmatprep.subr.bf16.mxu0 %v2338_v19  ;;  %v2287_v19 = vld [vmem:[#allocation6 + $0x170] ss:$8 sps:$4 sm:$0xff]  }
  0xf8   :  { %1058 = vmatpush1.bf16.msra.mxu1 %v2239_v49 }
  0xf9   :  { %1059 = vmatprep.subr.bf16.mxu1 %v2244_v50  ;;  %623 = vmatmul.mubr.bf16.vlgmr.msra.gmra.mrb[4].mxu0 %v2869_v28  ;;  %v234_v28 = vsub.s32 1, %v2874_v27  ;;  %v242_v50 = vsub.s32 3, %v2874_v27 }
  0xfa   :  { %2012 = vmatpush3.bf16.msra.mxu0 %v2339_v20  ;;  %v2292_v20 = vld [vmem:[#allocation6 + $0x184] ss:$8 sps:$4 sm:$0xff]  }
  0xfb   :  { %2013 = vmatprep.subr.bf16.mxu0 %v2340_v21  ;;  %v235_v36 = vrot.slane %v2877_v32, %v234_v28  ;;  %v2290_v21 = vld [vmem:[#allocation6 + $0x180] ss:$8 sps:$4 sm:$0xff]  }
  0xfc   :  { %1060 = vmatpush1.bf16.msra.mxu1 %v2242_v51 }
  0xfd   :  { %1061 = vmatprep.subr.bf16.mxu1 %v2247_v52 }
  0xfe   :  { %2014 = vmatpush3.bf16.msra.mxu0 %v2341_v22  ;;  %v2295_v22 = vld [vmem:[#allocation6 + $0x194] ss:$8 sps:$4 sm:$0xff]  }
  0xff   :  { %2015 = vmatprep.subr.bf16.mxu0 %v2342_v23  ;;  %v2293_v23 = vld [vmem:[#allocation6 + $0x190] ss:$8 sps:$4 sm:$0xff]  }
 0x100   :  { %1062 = vmatpush1.bf16.msra.mxu1 %v2245_v53  ;;  %v2266_v53 = vld [vmem:[#allocation6 + $0x100] ss:$8 sps:$4 sm:$0xff]  }
 0x101   :  { %1063 = vmatprep.subr.bf16.mxu1 %v2250_v54  ;;  %v2271_v54 = vld [vmem:[#allocation6 + $0x114] ss:$8 sps:$4 sm:$0xff]  }
 0x102   :  { %2016 = vmatpush3.bf16.msra.mxu0 %v2343_v25  ;;  %v2296_v25 = vld [vmem:[#allocation6 + $0x1a0] ss:$8 sps:$4 sm:$0xff]  }
 0x103   :  { %2017 = vmatprep.subr.bf16.mxu0 %v2344_v26  ;;  %v2301_v26 = vld [vmem:[#allocation6 + $0x1b4] ss:$8 sps:$4 sm:$0xff]  }
 0x104   :  { %1064 = vmatpush1.bf16.msra.mxu1 %v2248_v55  ;;  %v239_v55 = vrot.slane %v2877_v32, %v238_v47  ;;  %v250_v47 = vsub.s32 5, %v2874_v27 }
 0x105   :  { %1065 = vmatprep.subr.bf16.mxu1 %v2253_v56  ;;  %v243_v56 = vrot.slane %v2877_v32, %v242_v50 }
 0x106   :  { %2018 = vmatpush3.bf16.msra.mxu0 %v2345_v29  ;;  %v2299_v29 = vld [vmem:[#allocation6 + $0x1b0] ss:$8 sps:$4 sm:$0xff]   ;;  %v251_v50 = vrot.slane %v2877_v32, %v250_v47 }
 0x107   :  { %2019 = vmatprep.subr.bf16.mxu0 %v2346_v30  ;;  %v2304_v30 = vld [vmem:[#allocation6 + $0x1c4] ss:$8 sps:$4 sm:$0xff]  }
 0x108   :  { %1066 = vmatpush1.bf16.msra.mxu1 %v2251_v57  ;;  %v2269_v57 = vld [vmem:[#allocation6 + $0x110] ss:$8 sps:$4 sm:$0xff]  }
 0x109   :  { %1067 = vmatprep.subr.bf16.mxu1 %v2256_v58 }
 0x10a   :  { %2020 = vmatpush3.bf16.msra.mxu0 %v2347_v33  ;;  %v2302_v33 = vld [vmem:[#allocation6 + $0x1c0] ss:$8 sps:$4 sm:$0xff]  }
 0x10b   :  { %2021 = vmatprep.subr.bf16.mxu0 %v2348_v34  ;;  %v2307_v34 = vld [vmem:[#allocation6 + $0x1d4] ss:$8 sps:$4 sm:$0xff]  }
 0x10c   :  { %1068 = vmatpush1.bf16.msra.mxu1 %v2254_v59  ;;  %v2274_v59 = vld [vmem:[#allocation6 + $0x124] ss:$8 sps:$4 sm:$0xff]  }
 0x10d   :  { %1069 = vmatprep.subr.bf16.mxu1 %v2259_v60 }
 0x110   :  { %1070 = vmatpush1.bf16.msra.mxu1 %v2257_v61 }
 0x111   :  { %1071 = vmatprep.subr.bf16.mxu1 %v2262_v62 }
 0x114   :  { %1072 = vmatpush1.bf16.msra.mxu1 %v2260_v63 }
 0x115   :  { %1073 = vmatprep.subr.bf16.mxu1 %v2265_v0 }
 0x118   :  { %1074 = vmatpush1.bf16.msra.mxu1 %v2263_v1 }
 0x119   :  { %1086 = vmatprep.subr.bf16.mxu1 %v2268_v2 }
 0x1ab   :  { %v538_v37 = vpop.f32.mrb[0].mxu0 }
 0x1ac   :  { %v539_v38 = vadd.f32 %v538_v37, %v231_v35  ;;  %v540_v39 = vpop.f32.mrb[1].mxu0  ;;  %v2308_v37 = vld [vmem:[#allocation6 + $0x1e0] ss:$8 sps:$4 sm:$0xff]  }
 0x1ad   :  { %v541_v40 = vadd.f32 %v540_v39, %v235_v36  ;;  %v542_v41 = vpop.f32.mrb[2].mxu0  ;;  %v2311_v39 = vld [vmem:[#allocation6 + $0x1f0] ss:$8 sps:$4 sm:$0xff]  }
 0x1ae   :  { %v543_v42 = vadd.f32 %v542_v41, %v231_v35  ;;  %v544_v43 = vpop.f32.mrb[3].mxu0  ;;  %v633_v45 = vmax.f32 %v539_v38, 0.0  ;;  %v581_v58 = vpop.f32.mrb[0].mxu1  ;;  %v2305_v35 = vld [vmem:[#allocation6 + $0x1d0] ss:$8 sps:$4 sm:$0xff]  }
 0x1af   :  { %v545_v44 = vadd.f32 %v544_v43, %v235_v36  ;;  %v634_v48 = vmax.f32 %v541_v40, 0.0  ;;  %v582_v60 = vadd.f32 %v581_v58, %v239_v55  ;;  %v583_v61 = vpop.f32.mrb[1].mxu1  ;;  %v2310_v36 = vld [vmem:[#allocation6 + $0x1e4] ss:$8 sps:$4 sm:$0xff]   ;;  %v2313_v38 = vld [vmem:[#allocation6 + $0x1f4] ss:$8 sps:$4 sm:$0xff]  }
 0x1b0   :  { %v637_v46 = vmax.f32 %v543_v42, 0.0  ;;  %v584_v62 = vadd.f32 %v583_v61, %v243_v56  ;;  %v585_v63 = vpop.f32.mrb[2].mxu1  ;;  %v2349_v40 = vld [vmem:[#allocation7 + $0x28] sm:$0xff]   ;;  %v2350_v41 = vld [vmem:[#allocation7 + $0x70] sm:$0xff]   ;;  %v2352_v43 = vld [vmem:[#allocation7 + $0x78] sm:$0xff]  }
 0x1b1   :  { %v638_v49 = vmax.f32 %v545_v44, 0.0  ;;  %v635_v0 = vmax.f32 %v582_v60, 0.0  ;;  %v586_v1 = vadd.f32 %v585_v63, %v239_v55  ;;  %v587_v2 = vpop.f32.mrb[3].mxu1  ;;  %2022 = vmatpush3.bf16.msra.mxu0 %v2349_v40  ;;  %v2351_v42 = vld [vmem:[#allocation7 + $0x30] sm:$0xff]   ;;  %v2353_v44 = vld [vmem:[#allocation7 + $0x38] sm:$0xff]   ;;  %v2643_v60 = vmov 0.0  }
 0x1b2   :  { %v641_v51 = vpack.c.bf16 %v637_v46, %v633_v45  ;;  %v636_v4 = vmax.f32 %v584_v62, 0.0  ;;  %v588_v5 = vadd.f32 %v587_v2, %v243_v56  ;;  %2023 = vmatprep.subr.bf16.mxu0 %v2350_v41  ;;  %v2354_v45 = vld [vmem:[#allocation10 + $0x40] sm:$0xff]   ;;  %v246_v46 = vsub.s32 4, %v2874_v27  ;;  %v711_v61 = vld [vmem:[%s2968_s4] sm:$0x3]  ;;  %v2357_v27 = vld [vmem:[#allocation10 + $0x8] sm:$0xff]  }
 0x1b3   :  { %v642_v52 = vpack.c.bf16 %v638_v49, %v634_v48  ;;  %v639_v7 = vmax.f32 %v586_v1, 0.0  ;;  %v716_v62 = vrot.slane %v711_v61, %v230_v31  ;;  %v2358_v31 = vld [vmem:[#allocation10 + $0x50] sm:$0xff]   ;;  %v1951_v41 = vld [vmem:[%s2970_s6] ss:$0 sm:$0xff] }
 0x1b4   :  { %v640_v8 = vmax.f32 %v588_v5, 0.0  ;;  %v247_v48 = vrot.slane %v2877_v32, %v246_v46  ;;  %v720_v32 = vrot.slane %v711_v61, %v234_v28  ;;  %v2359_v28 = vld [vmem:[#allocation10 + $0x10] sm:$0xff]   ;;  %v2378_v46 = vld [vmem:[#allocation13] sm:$0xff]   ;;  %v2385_v61 = vld [vmem:[#allocation13 + $0x38] sm:$0xff]  }
 0x1b5   :  { %1075 = vmatprep.mubr.bf16.mxu1 %v642_v52  ;;  %v643_v9 = vpack.c.bf16 %v639_v7, %v635_v0  ;;  %2024 = vmatpush3.bf16.msra.mxu0 %v2351_v42 }
 0x1b6   :  { %1076 = vmatmul.mubr.bf16.vlgmr.msra.gmra.mrb[4].mxu1 %v641_v51  ;;  %v644_v11 = vpack.c.bf16 %v640_v8, %v636_v4  ;;  %2025 = vmatprep.subr.bf16.mxu0 %v2352_v43 }
 0x1b7   :  { %1087 = vmatpush1.bf16.msra.mxu1 %v2266_v53 }
 0x1b8   :  { %1088 = vmatprep.subr.bf16.mxu1 %v2271_v54  ;;  %1118 = vmatprep.mubr.bf16.mxu1 %v644_v11 }
 0x1b9   :  { %2026 = vmatpush3.bf16.msra.mxu0 %v2353_v44 }
 0x1ba   :  { %2033 = vmatprep.subr.bf16.mxu0 %v2354_v45 }
 0x1bb   :  { %1089 = vmatpush1.bf16.msra.mxu1 %v2269_v57 }
 0x1bc   :  { %1090 = vmatprep.subr.bf16.mxu1 %v2274_v59 }
 0x1bf   :  { %1091 = vmatpush1.bf16.msra.mxu1 %v2272_v3 }
 0x1c0   :  { %1092 = vmatprep.subr.bf16.mxu1 %v2277_v6 }
 0x1c3   :  { %1093 = vmatpush1.bf16.msra.mxu1 %v2275_v10 }
 0x1c4   :  { %1094 = vmatprep.subr.bf16.mxu1 %v2280_v12 }
 0x1c7   :  { %1095 = vmatpush1.bf16.msra.mxu1 %v2278_v13  ;;  %v2355_v13 = vld [vmem:[#allocation10] sm:$0xff]  }
 0x1c8   :  { %1096 = vmatprep.subr.bf16.mxu1 %v2283_v14  ;;  %v2356_v14 = vld [vmem:[#allocation10 + $0x48] sm:$0xff]  }
 0x1cb   :  { %1097 = vmatpush1.bf16.msra.mxu1 %v2281_v15  ;;  %v2360_v15 = vld [vmem:[#allocation10 + $0x58] sm:$0xff]  }
 0x1cc   :  { %1098 = vmatprep.subr.bf16.mxu1 %v2286_v16  ;;  %v624_v49 = vpop.f32.mrb[4].mxu0  ;;  %v2361_v16 = vld [vmem:[#allocation10 + $0x18] sm:$0xff]  }
 0x1cd   :  { %v626_v51 = vpop.f32.mrb[5].mxu0  ;;  %v625_v52 = vadd.f32 %v624_v49, %v247_v48  ;;  %v2380_v49 = vld [vmem:[#allocation13 + $0x10] sm:$0xff]  }
 0x1ce   :  { %v627_v53 = vadd.f32 %v626_v51, %v251_v50  ;;  %v628_v54 = vpop.f32.mrb[6].mxu0  ;;  %v2382_v51 = vld [vmem:[#allocation13 + $0x20] sm:$0xff]  }
 0x1cf   :  { %1099 = vmatpush1.bf16.msra.mxu1 %v2284_v17  ;;  %v629_v55 = vadd.f32 %v628_v54, %v247_v48  ;;  %v630_v56 = vpop.f32.mrb[7].mxu0  ;;  %v2362_v17 = vld [vmem:[#allocation10 + $0x60] sm:$0xff]   ;;  %v2379_v48 = vld [vmem:[#allocation13 + $0x8] sm:$0xff]  }
 0x1d0   :  { %1100 = vmatprep.subr.bf16.mxu1 %v2289_v18  ;;  %v631_v57 = vadd.f32 %v630_v56, %v251_v50  ;;  %v2363_v18 = vld [vmem:[#allocation10 + $0x20] sm:$0xff]  }
 0x1d1   :  { %v645_v58 = vpack.c.bf16 %v629_v55, %v625_v52  ;;  %v2381_v50 = vld [vmem:[#allocation13 + $0x18] sm:$0xff]  }
 0x1d2   :  { %v646_v59 = vpack.c.bf16 %v631_v57, %v627_v53 }
 0x1d3   :  { %1101 = vmatpush1.bf16.msra.mxu1 %v2287_v19  ;;  %v2364_v19 = vld [vmem:[#allocation10 + $0x68] sm:$0xff]  }
 0x1d4   :  { %1102 = vmatprep.subr.bf16.mxu1 %v2292_v20  ;;  %v2365_v20 = vld [vmem:[#allocation10 + $0x28] sm:$0xff]  }
 0x1d7   :  { %1103 = vmatpush1.bf16.msra.mxu1 %v2290_v21  ;;  %v2366_v21 = vld [vmem:[#allocation10 + $0x70] sm:$0xff]  }
 0x1d8   :  { %1104 = vmatprep.subr.bf16.mxu1 %v2295_v22  ;;  %v2367_v22 = vld [vmem:[#allocation10 + $0x30] sm:$0xff]  }
 0x1db   :  { %1105 = vmatpush1.bf16.msra.mxu1 %v2293_v23  ;;  %v2368_v23 = vld [vmem:[#allocation10 + $0x78] sm:$0xff]  }
 0x1dc   :  { %1106 = vmatprep.subr.bf16.mxu1 %v2298_v24  ;;  %v2369_v24 = vld [vmem:[#allocation10 + $0x38] sm:$0xff]  }
 0x1df   :  { %1107 = vmatpush1.bf16.msra.mxu1 %v2296_v25  ;;  %v2370_v25 = vld [vmem:[#allocation9] sm:$0xff]  }
 0x1e0   :  { %1108 = vmatprep.subr.bf16.mxu1 %v2301_v26  ;;  %v2371_v26 = vld [vmem:[#allocation9 + $0x8] sm:$0xff]  }
 0x1e3   :  { %1109 = vmatpush1.bf16.msra.mxu1 %v2299_v29  ;;  %v2372_v29 = vld [vmem:[#allocation9 + $0x10] sm:$0xff]  }
 0x1e4   :  { %1110 = vmatprep.subr.bf16.mxu1 %v2304_v30  ;;  %v2373_v30 = vld [vmem:[#allocation9 + $0x18] sm:$0xff]  }
 0x1e7   :  { %1111 = vmatpush1.bf16.msra.mxu1 %v2302_v33  ;;  %v2374_v33 = vld [vmem:[#allocation9 + $0x20] sm:$0xff]  }
 0x1e8   :  { %1112 = vmatprep.subr.bf16.mxu1 %v2307_v34  ;;  %v2375_v34 = vld [vmem:[#allocation9 + $0x28] sm:$0xff]  }
 0x1eb   :  { %1113 = vmatpush1.bf16.msra.mxu1 %v2305_v35  ;;  %v2376_v35 = vld [vmem:[#allocation9 + $0x30] sm:$0xff]  }
 0x1ec   :  { %1114 = vmatprep.subr.bf16.mxu1 %v2310_v36  ;;  %v2377_v36 = vld [vmem:[#allocation9 + $0x38] sm:$0xff]  }
 0x1ef   :  { %1115 = vmatpush1.bf16.msra.mxu1 %v2308_v37 }
 0x1f0   :  { %1116 = vmatprep.subr.bf16.mxu1 %v2313_v38 }
 0x1f3   :  { %1117 = vmatpush1.bf16.msra.mxu1 %v2311_v39 }
 0x1f4   :  { %2122 = vmatprep.subr.bf16.mxu1 %v2643_v60 }
 0x1f6   :  { %1119 = vmatmul.mubr.bf16.vlgmr.msra.gmra.mrb[4].mxu1 %v643_v9 }
 0x1f7   :  { %2138 = vmatprep.mubr.msk.bf16.mxu1 %vm2644_vm0, %v2643_v60 }
 0x2c9   :  { %v1120_v63 = vpop.f32.mrb[4].mxu1 }
 0x2ca   :  { %v2142_v0 = vadd.f32 %v1120_v63, %v716_v62  ;;  %v1122_v1 = vpop.f32.mrb[5].mxu1  ;;  %v2388_v63 = vld [vmem:[%s2976_s12 + $0x10] sm:$0xff]  }
 0x2cb   :  { %v2143_v2 = vadd.f32 %v1122_v1, %v720_v32  ;;  %v1124_v3 = vpop.f32.mrb[6].mxu1  ;;  %v2390_v1 = vld [vmem:[%s2976_s12 + $0x20] sm:$0xff]  }
 0x2cc   :  { %v2144_v4 = vadd.f32 %v1124_v3, %v716_v62  ;;  %v1126_v5 = vpop.f32.mrb[7].mxu1  ;;  %v1129_v7 = vmax.f32 %v2142_v0, 0.0  ;;  %v2386_v62 = vld [vmem:[%s2976_s12] sm:$0xff]   ;;  %v2389_v0 = vld [vmem:[%s2976_s12 + $0x18] sm:$0xff]  }
 0x2cd   :  { %v2145_v6 = vadd.f32 %v1126_v5, %v720_v32  ;;  %v1130_v9 = vmax.f32 %v2143_v2, 0.0  ;;  %2123 = vmatpush3.bf16.msra.mxu1 %v2386_v62  ;;  %v2387_v32 = vld [vmem:[%s2976_s12 + $0x8] sm:$0xff]  }
 0x2ce   :  { %v1131_v8 = vmax.f32 %v2144_v4, 0.0  ;;  %2124 = vmatprep.subr.bf16.mxu1 %v2643_v60  ;;  %v2391_v2 = vld [vmem:[%s2976_s12 + $0x28] sm:$0xff]   ;;  %v1992_v4 = vld [vmem:[#allocation12] ss:$0 sm:$0xff] }
 0x2cf   :  { %v1132_v10 = vmax.f32 %v2145_v6, 0.0 }
 0x2d0   :  { %v1133_v11 = vpack.c.bf16 %v1131_v8, %v1129_v7 }
 0x2d1   :  { %v1134_v12 = vpack.c.bf16 %v1132_v10, %v1130_v9  ;;  %2125 = vmatpush3.bf16.msra.mxu1 %v2387_v32 }
 0x2d2   :  { %2126 = vmatprep.subr.bf16.mxu1 %v2643_v60 }
 0x2d3   :  { %1302 = vmatprep.mubr.bf16.mxu0 %v1134_v12 }
 0x2d4   :  { %1303 = vmatmul.mubr.bf16.vlgmr.msra.gmra.mrb[8].mxu0 %v1133_v11 }
 0x2d5   :  { %2034 = vmatpush3.bf16.msra.mxu0 %v2355_v13  ;;  %1488 = vmatprep.mubr.bf16.mxu0 %v646_v59  ;;  %v2384_v59 = vld [vmem:[#allocation13 + $0x30] sm:$0xff]  }
 0x2d6   :  { %2035 = vmatprep.subr.bf16.mxu0 %v2356_v14  ;;  %2127 = vmatpush3.bf16.msra.mxu1 %v2388_v63 }
 0x2d7   :  { %2128 = vmatprep.subr.bf16.mxu1 %v2643_v60 }
 0x2d9   :  { %2036 = vmatpush3.bf16.msra.mxu0 %v2357_v27  ;;  %v2392_v27 = vld [vmem:[%s2976_s12 + $0x30] sm:$0xff]  }
 0x2da   :  { %2037 = vmatprep.subr.bf16.mxu0 %v2358_v31  ;;  %2129 = vmatpush3.bf16.msra.mxu1 %v2389_v0  ;;  %v2393_v31 = vld [vmem:[%s2976_s12 + $0x38] sm:$0xff]  }
 0x2db   :  { %2130 = vmatprep.subr.bf16.mxu1 %v2643_v60 }
 0x2dd   :  { %2038 = vmatpush3.bf16.msra.mxu0 %v2359_v28  ;;  %v1993_v28 = vld [vmem:[#allocation15] ss:$0 sm:$0xff] }
 0x2de   :  { %2039 = vmatprep.subr.bf16.mxu0 %v2360_v15  ;;  %2131 = vmatpush3.bf16.msra.mxu1 %v2390_v1 }
 0x2df   :  { %2132 = vmatprep.subr.bf16.mxu1 %v2643_v60 }
 0x2e1   :  { %2040 = vmatpush3.bf16.msra.mxu0 %v2361_v16 }
 0x2e2   :  { %2041 = vmatprep.subr.bf16.mxu0 %v2362_v17  ;;  %2133 = vmatpush3.bf16.msra.mxu1 %v2391_v2 }
 0x2e3   :  { %2134 = vmatprep.subr.bf16.mxu1 %v2643_v60 }
 0x2e5   :  { %2042 = vmatpush3.bf16.msra.mxu0 %v2363_v18 }
 0x2e6   :  { %2043 = vmatprep.subr.bf16.mxu0 %v2364_v19  ;;  %2135 = vmatpush3.bf16.msra.mxu1 %v2392_v27 }
 0x2e7   :  { %2136 = vmatprep.subr.bf16.mxu1 %v2643_v60 }
 0x2e9   :  { %2044 = vmatpush3.bf16.msra.mxu0 %v2365_v20 }
 0x2ea   :  { %2045 = vmatprep.subr.bf16.mxu0 %v2366_v21  ;;  %2137 = vmatpush3.bf16.msra.mxu1 %v2393_v31 }
 0x2ed   :  { %2046 = vmatpush3.bf16.msra.mxu0 %v2367_v22 }
 0x2ee   :  { %2047 = vmatprep.subr.bf16.mxu0 %v2368_v23 }
 0x2f1   :  { %2048 = vmatpush3.bf16.msra.mxu0 %v2369_v24  ;;  %v2002_v24 = vld [vmem:[#allocation16] ss:$0 sm:$0xff] }
 0x2f2   :  { %2082 = vmatprep.subr.bf16.mxu0 %v2643_v60 }
 0x2f4   :  { %1489 = vmatmul.mubr.bf16.vlgmr.msra.gmra.mrb[12].mxu0 %v645_v58  ;;  %v2383_v58 = vld [vmem:[#allocation13 + $0x28] sm:$0xff]  }
 0x2f5   :  { %2083 = vmatpush3.bf16.msra.mxu0 %v2370_v25  ;;  %2098 = vmatprep.mubr.msk.bf16.mxu0 %vm2644_vm0, %v2643_v60 }
 0x2f6   :  { %2084 = vmatprep.subr.bf16.mxu0 %v2643_v60 }
 0x2f9   :  { %2085 = vmatpush3.bf16.msra.mxu0 %v2371_v26 }
 0x2fa   :  { %2086 = vmatprep.subr.bf16.mxu0 %v2643_v60 }
 0x2fd   :  { %2087 = vmatpush3.bf16.msra.mxu0 %v2372_v29 }
 0x2fe   :  { %2088 = vmatprep.subr.bf16.mxu0 %v2643_v60 }
 0x301   :  { %2089 = vmatpush3.bf16.msra.mxu0 %v2373_v30 }
 0x302   :  { %2090 = vmatprep.subr.bf16.mxu0 %v2643_v60 }
 0x305   :  { %2091 = vmatpush3.bf16.msra.mxu0 %v2374_v33 }
 0x306   :  { %2092 = vmatprep.subr.bf16.mxu0 %v2643_v60 }
 0x309   :  { %2093 = vmatpush3.bf16.msra.mxu0 %v2375_v34 }
 0x30a   :  { %2094 = vmatprep.subr.bf16.mxu0 %v2643_v60 }
 0x30d   :  { %2095 = vmatpush3.bf16.msra.mxu0 %v2376_v35 }
 0x30e   :  { %2096 = vmatprep.subr.bf16.mxu0 %v2643_v60 }
 0x311   :  { %2097 = vmatpush3.bf16.msra.mxu0 %v2377_v36 }
 0x312   :  { %2102 = vmatprep.subr.bf16.mxu0 %v2643_v60 }
 0x3a7   :  { %v2027_v37 = vpop.f32.mrb[8].mxu0 }
 0x3a8   :  { %v2028_v38 = vpop.f32.mrb[9].mxu0 }
 0x3a9   :  { %v2029_v39 = vadd.f32 %v2028_v38, %v2027_v37  ;;  %v2030_v40 = vpop.f32.mrb[10].mxu0 }
 0x3aa   :  { %v2031_v42 = vpop.f32.mrb[11].mxu0 }
 0x3ab   :  { %v2032_v43 = vadd.f32 %v2031_v42, %v2030_v40  ;;  %v1305_v44 = vadd.f32 %v2029_v39, %v1951_v41 }
 0x3ad   :  { %v1308_v45 = vadd.f32 %v2032_v43, %v1951_v41 }
 0x3af   :  { %v1311_v47 = vpack.c.bf16 %v1308_v45, %v1305_v44 }
 0x3b1   :  { %2099 = vmatmul.mubr.bf16.vlgmr.msra.gmra.mrb[16].mxu0 %v1311_v47 }
 0x3b2   :  { %2103 = vmatpush3.bf16.msra.mxu0 %v2378_v46  ;;  %2118 = vmatprep.mubr.msk.bf16.mxu0 %vm2644_vm0, %v2643_v60 }
 0x3b3   :  { %2104 = vmatprep.subr.bf16.mxu0 %v2643_v60 }
 0x3b6   :  { %2105 = vmatpush3.bf16.msra.mxu0 %v2379_v48 }
 0x3b7   :  { %2106 = vmatprep.subr.bf16.mxu0 %v2643_v60 }
 0x3ba   :  { %2107 = vmatpush3.bf16.msra.mxu0 %v2380_v49 }
 0x3bb   :  { %2108 = vmatprep.subr.bf16.mxu0 %v2643_v60 }
 0x3be   :  { %2109 = vmatpush3.bf16.msra.mxu0 %v2381_v50 }
 0x3bf   :  { %2110 = vmatprep.subr.bf16.mxu0 %v2643_v60 }
 0x3c2   :  { %2111 = vmatpush3.bf16.msra.mxu0 %v2382_v51 }
 0x3c3   :  { %2112 = vmatprep.subr.bf16.mxu0 %v2643_v60 }
 0x3c6   :  { %2113 = vmatpush3.bf16.msra.mxu0 %v2383_v58 }
 0x3c7   :  { %v2049_v52 = vpop.f32.mrb[12].mxu0  ;;  %2114 = vmatprep.subr.bf16.mxu0 %v2643_v60 }
 0x3c8   :  { %v2050_v53 = vpop.f32.mrb[13].mxu0 }
 0x3c9   :  { %v2051_v54 = vadd.f32 %v2050_v53, %v2049_v52  ;;  %v2052_v55 = vpop.f32.mrb[14].mxu0 }
 0x3ca   :  { %v2053_v56 = vpop.f32.mrb[15].mxu0  ;;  %2115 = vmatpush3.bf16.msra.mxu0 %v2384_v59 }
 0x3cb   :  { %v2054_v57 = vadd.f32 %v2053_v56, %v2052_v55  ;;  %2116 = vmatprep.subr.bf16.mxu0 %v2643_v60 }
 0x3ce   :  { %2117 = vmatpush3.bf16.msra.mxu0 %v2385_v61 }
 0x484   :  { %v1579_v3 = vpop.f32.mrb[16].mxu0 }
 0x485   :  { %v1580_v5 = vadd.f32 %v2051_v54, %v1579_v3  ;;  %v2100_v6 = vpop.f32.mrb[17].mxu0 }
 0x486   :  { %v1582_v7 = vpop.f32.mrb[18].mxu0 }
 0x487   :  { %v1593_v8 = vadd.f32 %v1992_v4, %v1580_v5  ;;  %v1583_v9 = vadd.f32 %v2054_v57, %v1582_v7  ;;  %v2101_v10 = vpop.f32.mrb[19].mxu0 }
 0x489   :  { %v1594_v11 = vadd.f32 %v1992_v4, %v1583_v9  ;;  %v1595_v12 = vmax.f32 %v1593_v8, 0.0 }
 0x48b   :  { %v1596_v13 = vmax.f32 %v1594_v11, 0.0 }
 0x48d   :  { %v1597_v14 = vpack.c.bf16 %v1596_v13, %v1595_v12 }
 0x48f   :  { %2119 = vmatmul.mubr.bf16.vlgmr.msra.gmra.mrb[20].mxu0 %v1597_v14 }
 0x562   :  { %v1703_v15 = vpop.f32.mrb[20].mxu0 }
 0x563   :  { %v1704_v16 = vadd.f32 %v1993_v28, %v1703_v15  ;;  %v2120_v17 = vpop.f32.mrb[21].mxu0 }
 0x564   :  { %v1706_v18 = vpop.f32.mrb[22].mxu0 }
 0x565   :  { %v1707_v19 = vadd.f32 %v1993_v28, %v1706_v18  ;;  %v2121_v20 = vpop.f32.mrb[23].mxu0  ;;  %v1710_v21 = vmax.f32 %v1704_v16, 0.0 }
 0x567   :  { %v1711_v22 = vmax.f32 %v1707_v19, 0.0 }
 0x569   :  { %v1712_v23 = vpack.c.bf16 %v1711_v22, %v1710_v21 }
 0x56b   :  { %2139 = vmatmul.mubr.bf16.vlgmr.msra.gmra.mrb[8].mxu1 %v1712_v23 }
 0x63e   :  { %v1818_v25 = vpop.f32.mrb[8].mxu1 }
 0x63f   :  { %v1819_v60 = vadd.f32 %v2002_v24, %v1818_v25  ;;  %v2140_v26 = vpop.f32.mrb[9].mxu1 }
 0x640   :  { %v1821_v29 = vpop.f32.mrb[10].mxu1 }
 0x641   :  { %1826 = vst.msk [vmem:[%s2978_s14] sm:$0xff] %vm1825_vm1, %v1819_v60  ;;  %v1822_v30 = vadd.f32 %v2002_v24, %v1821_v29  ;;  %v2141_v33 = vpop.f32.mrb[11].mxu1 }
 0x643   :  { %1827 = vst.msk [vmem:[%s2978_s14 + $0x8] sm:$0xff] %vm1825_vm1, %v1822_v30 }
 0x644   :  { %1832 = vsyncpa [#allocation3], 1 }
 0x645   :  { %1833 = vsyncpa [#allocation5], 1 }
 0x646   :  { %1834 = vsyncpa [#allocation8], 1 }
 0x647   :  { %1835 = vsyncpa [#allocation11], 1 }
 0x648   :  { %1836 = vsyncpa [#allocation14], 1 }
 0x649   :  { %1837 = vsyncpa [#allocation17], 1 }

</bundles_post_ra>
